<compile_context>
chip_gen: v7x
topology: tpu7x:2x2x1
jax: 0.10.0
libtpu: 0.0.40
codegen_flags: <defaults>
</compile_context>

<pallas_src>
import jax
import jax.numpy as jnp
from jax import lax
from jax.experimental import pallas as pl
from jax.experimental.pallas import tpu as pltpu

_NT = (((1,), (1,)), ((), ()))   # contract last dim of both operands (A @ B^T)


# ----------------------------------------------------------------------------------
# Fused Pallas kernel: ASTGCN block + final conv
# ----------------------------------------------------------------------------------
def _astgcn_fused_kernel(
    xf_ref,     # (B*N, F*T)     f32   batch-stacked input
    u1_ref,     # (1, N)         f32
    u2_ref,     # (F, N)         f32
    u3b_ref,    # (F*T, T)       f32   kron(U3, I_T)
    be_ref,     # (T, T)         f32
    ve_ref,     # (T, T)         f32
    w1_ref,     # (1, T)         f32
    w2b_ref,    # (F*T, T)       f32   kron(W2, ones(T,1))
    w3b_ref,    # (F*T, T)       f32   kron(W3, I_T)
    bs_ref,     # (N, N)         f32
    vs_ref,     # (N, N)         f32
    a_ref,      # (N, N)         f32   adjacency
    tilet_ref,  # (T, F*T)       f32   kron(ones(1,F), I_T): tiles a (1,T) row to (1,F*T)
    gwb_ref,    # (F*T, G*T)     bf16  kron(gcn_W, I_T)
    tcb_ref,    # (G*T, C*Tout)  bf16  time-conv taps + stride + padding folded
    resb_ref,   # (F*T, C*Tout)  bf16  residual 1x1 conv + stride folded
    btot_ref,   # (1, C*Tout)    f32   time-conv bias + residual bias
    lnr_ref,    # (C*Tout, Tout) f32   LayerNorm channel-mean reduce
    lnbc_ref,   # (Tout, C*Tout) f32   LayerNorm broadcast back
    wfe_ref,    # (C*Tout, P)    bf16  final conv weight with LN affine folded in
    bfe_ref,    # (1, P)         f32   final conv bias with LN affine folded in
    o_ref,      # (B*N, P)       f32
):
    f32 = jnp.float32
    bf16 = jnp.bfloat16

    N = a_ref.shape[0]
    T = ve_ref.shape[0]
    BN, FT = xf_ref.shape
    B = BN // N
    F = FT // T

    # Stacked input (tiny) and the small attention parameters, bound once.
    # Big folded weights are deliberately NOT bound here (point-of-use loads).
    Xs = xf_ref[...]
    u1, u2, u3b = u1_ref[...], u2_ref[...], u3b_ref[...]
    be, ve = be_ref[...], ve_ref[...]
    w1, w2b, w3b = w1_ref[...], w2b_ref[...], w3b_ref[...]
    bs, vs, adj = bs_ref[...], vs_ref[...], a_ref[...]
    tilet = tilet_ref[...]

    # ------------- per-batch attention + neighbourhood aggregation -----------------
    tmp_rows = []
    for b in range(B):                         # B is tiny and static: unrolled
        X = Xs[b * N:(b + 1) * N, :]           # (N, F*T)

        # Temporal attention: E_norm (T, T), softmax over axis 0 (torch dim 1).
        u1x = jnp.dot(u1, X, preferred_element_type=f32)                 # (1, F*T)
        lhs_ft = jnp.concatenate(
            [u1x[:, f * T:(f + 1) * T] for f in range(F)], axis=0)       # (F, T)
        xu3 = jnp.dot(X, u3b, preferred_element_type=f32)                # (N, T)
        u2xu3 = jnp.dot(u2, xu3, preferred_element_type=f32)             # (F, T)
        # (4,8) tile: the explicit transpose is one cheap XLU op; kept for robustness.
        prod_t = jnp.dot(lhs_ft.T, u2xu3, preferred_element_type=f32)    # (T, T)
        E = jnp.dot(ve, jax.nn.sigmoid(prod_t + be), preferred_element_type=f32)
        E = E - jnp.max(E, axis=0, keepdims=True)
        expE = jnp.exp(E)
        e_norm = expE / jnp.sum(expE, axis=0, keepdims=True)             # (T, T)

        # Spatial attention on x_TAt with E_norm folded in (x_TAt never materialized).
        ew1 = lax.dot_general(w1, e_norm, _NT, preferred_element_type=f32)       # (1, T)
        ew1_t = jnp.dot(ew1, tilet, preferred_element_type=f32)                  # (1, F*T)
        lhs_s = jnp.dot(X * ew1_t, w2b, preferred_element_type=f32)              # (N, T)
        xw3 = jnp.dot(X, w3b, preferred_element_type=f32)                        # (N, T)
        rhs_s = jnp.dot(xw3, e_norm, preferred_element_type=f32)                 # (N, T)
        prod_s = lax.dot_general(lhs_s, rhs_s, _NT, preferred_element_type=f32)  # (N, N)
        S = jnp.dot(vs, jax.nn.sigmoid(prod_s + bs), preferred_element_type=f32)
        S = S - jnp.max(S, axis=0, keepdims=True)
        expS = jnp.exp(S)
        s_norm = expS / jnp.sum(expS, axis=0, keepdims=True)             # (N, N)

        # GCN neighbourhood aggregation with attention-weighted adjacency.
        tmp_rows.append(jnp.dot(s_norm * adj, X, preferred_element_type=f32))    # (N, F*T)

    tmp = jnp.concatenate(tmp_rows, axis=0) if B > 1 else tmp_rows[0]    # (B*N, F*T)

    # ------------- batch-stacked shared-weight matmuls (bf16 MXU, f32 accum) -------
    gcn = jnp.maximum(
        jnp.dot(tmp.astype(bf16), gwb_ref[...], preferred_element_type=f32), 0.0)   # (B*N, G*T)
    out_t = jnp.dot(gcn.astype(bf16), tcb_ref[...], preferred_element_type=f32)      # (B*N, C*Tout)
    out_r = jnp.dot(Xs.astype(bf16), resb_ref[...], preferred_element_type=f32)      # (B*N, C*Tout)
    relued = jnp.maximum(out_t + out_r + btot_ref[...], 0.0)                          # (B*N, C*Tout)

    # ------------- LayerNorm over channels: factorized reduce + broadcast (f32) ----
    mean = jnp.dot(jnp.dot(relued, lnr_ref[...], preferred_element_type=f32),
                   lnbc_ref[...], preferred_element_type=f32)
    cen = relued - mean
    var = jnp.dot(jnp.dot(cen * cen, lnr_ref[...], preferred_element_type=f32),
                  lnbc_ref[...], preferred_element_type=f32)
    normed = cen * lax.rsqrt(var + 1e-5)

    # ------------- final [1, G] conv (LayerNorm affine folded into weights) --------
    o_ref[...] = (jnp.dot(normed.astype(bf16), wfe_ref[...],
                          preferred_element_type=f32) + bfe_ref[...])    # (B*N, P)


# ----------------------------------------------------------------------------------
# Wrapper glue (plain JAX): fold module parameters into MXU-friendly operands
# ----------------------------------------------------------------------------------
def _full_spec(a):
    zeros = (0,) * a.ndim
    return pl.BlockSpec(a.shape, lambda i, _z=zeros: _z)


def prepare_operands(x, p, strides):
    f32, bf16 = jnp.float32, jnp.bfloat16
    B, N, F, T = x.shape
    G = p["gcn_w"].shape[1]
    C = p["tconv_w"].shape[0]
    Tout = (T - 1) // strides + 1

    eye_t = jnp.eye(T, dtype=f32)
    eye_to = jnp.eye(Tout, dtype=f32)
    t_i = jnp.arange(T)[:, None]
    t_o = jnp.arange(Tout)[None, :]
    sel = (t_i == strides * t_o).astype(f32)                              # (T, Tout)
    shifts = [(t_i == strides * t_o + k - 1).astype(f32) for k in range(3)]

    # time conv: 3 taps + stride + zero padding folded into one (G*T, C*Tout) matrix
    tw = p["tconv_w"]                                                     # (C, G, 1, 3)
    tc_big = (jnp.kron(tw[:, :, 0, 0].T, shifts[0])
              + jnp.kron(tw[:, :, 0, 1].T, shifts[1])
              + jnp.kron(tw[:, :, 0, 2].T, shifts[2]))                    # (G*T, C*Tout)
    res_big = jnp.kron(p["rconv_w"][:, :, 0, 0].T, sel)                   # (F*T, C*Tout)
    b_total = jnp.repeat(p["tconv_b"] + p["rconv_b"], Tout)[None, :]      # (1, C*Tout)

    # LayerNorm channel mean: factorized reduce + broadcast (replaces 256x256 avg)
    ln_r = jnp.kron(jnp.ones((C, 1), f32) / C, eye_to)                    # (C*Tout, Tout)
    ln_bc = jnp.kron(jnp.ones((1, C), f32), eye_to)                       # (Tout, C*Tout)

    # final conv weight (P, Tout, 1, G) -> (C*Tout, P) with the LayerNorm affine folded in.
    # The reference keeps only output spatial index 0, i.e. block channels 0..G-1.
    wfa = p["fconv_w"][:, :, 0, :]                                        # (P, Tout, G)
    wft = jnp.transpose(wfa, (2, 1, 0))                                   # (G, Tout, P)
    if C > G:
        wft = jnp.pad(wft, ((0, C - G), (0, 0), (0, 0)))
    wf_eff = (wft * p["ln_g"][:, None, None]).reshape(C * Tout, -1)       # (C*Tout, P)
    bf_eff = (p["fconv_b"] + jnp.einsum("ptg,g->p", wfa, p["ln_b"][:G]))[None, :]

    return (
        x.reshape(B * N, F * T),                                          # batch-stacked input
        p["U1"].reshape(1, N),
        p["U2"],
        jnp.kron(p["U3"][:, None], eye_t),                                # (F*T, T)
        p["be"].reshape(T, T),
        p["Ve"],
        p["W1"].reshape(1, T),
        jnp.kron(p["W2"], jnp.ones((T, 1), f32)),                         # (F*T, T)
        jnp.kron(p["W3"][:, None], eye_t),                                # (F*T, T)
        p["bs"].reshape(N, N),
        p["Vs"],
        p["A"],
        jnp.kron(jnp.ones((1, F), f32), eye_t),                           # (T, F*T)
        jnp.kron(p["gcn_w"], eye_t).astype(bf16),                         # (F*T, G*T)
        tc_big.astype(bf16),
        res_big.astype(bf16),
        b_total,
        ln_r,
        ln_bc,
        wf_eff.astype(bf16),
        bf_eff,
    )


def astgcn_submodule(x, params, strides=1):
    B, N, F, T = x.shape
    P = params["fconv_w"].shape[0]
    args = prepare_operands(x, params, strides)
    in_specs = [_full_spec(a) for a in args]
    out_flat = pl.pallas_call(
        _astgcn_fused_kernel,
        out_shape=jax.ShapeDtypeStruct((B * N, P), jnp.float32),
        grid_spec=pltpu.PrefetchScalarGridSpec(
            num_scalar_prefetch=0,
            grid=(1,),
            in_specs=in_specs,
            out_specs=pl.BlockSpec((B * N, P), lambda i: (0, 0)),
        ),
        compiler_params=pltpu.CompilerParams(dimension_semantics=("arbitrary",)),
    )(*args)
    return out_flat.reshape(B, N, P)


def init_params(key, N, F, T, G, C, P, strides=1, scale=0.1):
    """Parameters in the PyTorch module's native shapes.  (torch inits GCN.W to zeros;
    a small random init is used so the forward output is non-degenerate.)"""
    Tout = (T - 1) // strides + 1
    ks = jax.random.split(key, 18)

    def rnd(k, shape):
        return (scale * jax.random.normal(k, shape)).astype(jnp.float32)

    return dict(
        # Temporal attention (U_1, U_2, U_3, b_e, V_e)
        U1=rnd(ks[0], (N,)), U2=rnd(ks[1], (F, N)), U3=rnd(ks[2], (F,)),
        be=rnd(ks[3], (1, T, T)), Ve=rnd(ks[4], (T, T)),
        # Spatial attention (W_1, W_2, W_3, b_s, V_s)
        W1=rnd(ks[5], (T,)), W2=rnd(ks[6], (F, T)), W3=rnd(ks[7], (F,)),
        bs=rnd(ks[8], (1, N, N)), Vs=rnd(ks[9], (N, N)),
        # Graph conv: adjacency A and weight W
        A=rnd(ks[10], (N, N)), gcn_w=rnd(ks[11], (F, G)),
        # time conv Conv2d(G, C, [1,3], stride=[1,s], padding=[0,1])
        tconv_w=rnd(ks[12], (C, G, 1, 3)), tconv_b=rnd(ks[13], (C,)),
        # residual conv Conv2d(F, C, [1,1], stride=[1,s])
        rconv_w=rnd(ks[14], (C, F, 1, 1)), rconv_b=rnd(ks[15], (C,)),
        # LayerNorm(C) default affine init
        ln_g=jnp.ones((C,), jnp.float32), ln_b=jnp.zeros((C,), jnp.float32),
        # final conv Conv2d(Tout, P, [1, G])
        fconv_w=rnd(ks[16], (P, Tout, 1, G)), fconv_b=rnd(ks[17], (P,)),
    )


# ----------------------------------------------------------------------------------
if __name__ == "__main__":
    # Single-block configuration:
    #   in_channels=F, in_timesteps=T, out_channels=C, n_vertices=N,
    #   gcn_filters=G (== C so the final [1, G] conv output has spatial width 1,
    #   matching the reference's x[..., 0]), tcn_strides=1, n_predictions=P.
    B, N, F, T = 2, 16, 4, 8
    G = C = 32
    P = 4
    strides = 1

    key = jax.random.PRNGKey(0)
    kx, kp = jax.random.split(key)
    x = jax.random.normal(kx, (B, N, F, T), jnp.float32)
    params = init_params(kp, N, F, T, G, C, P, strides)

    out = jax.block_until_ready(astgcn_submodule(x, params, strides))

    assert out.shape == (B, N, P), out.shape
    assert bool(jnp.all(jnp.isfinite(out)))
    print("KERNEL_OK")
</pallas_src>

<mosaic_0001>
module attributes {stable_mosaic.version = 11 : i64} {
  func.func @_astgcn_fused_kernel(%arg0: i32, %arg1: memref<32x32xf32, #tpu.memory_space<vmem>>, %arg2: memref<1x16xf32, #tpu.memory_space<vmem>>, %arg3: memref<4x16xf32, #tpu.memory_space<vmem>>, %arg4: memref<32x8xf32, #tpu.memory_space<vmem>>, %arg5: memref<8x8xf32, #tpu.memory_space<vmem>>, %arg6: memref<8x8xf32, #tpu.memory_space<vmem>>, %arg7: memref<1x8xf32, #tpu.memory_space<vmem>>, %arg8: memref<32x8xf32, #tpu.memory_space<vmem>>, %arg9: memref<32x8xf32, #tpu.memory_space<vmem>>, %arg10: memref<16x16xf32, #tpu.memory_space<vmem>>, %arg11: memref<16x16xf32, #tpu.memory_space<vmem>>, %arg12: memref<16x16xf32, #tpu.memory_space<vmem>>, %arg13: memref<8x32xf32, #tpu.memory_space<vmem>>, %arg14: memref<32x256xbf16, #tpu.memory_space<vmem>>, %arg15: memref<256x256xbf16, #tpu.memory_space<vmem>>, %arg16: memref<32x256xbf16, #tpu.memory_space<vmem>>, %arg17: memref<1x256xf32, #tpu.memory_space<vmem>>, %arg18: memref<256x8xf32, #tpu.memory_space<vmem>>, %arg19: memref<8x256xf32, #tpu.memory_space<vmem>>, %arg20: memref<256x4xbf16, #tpu.memory_space<vmem>>, %arg21: memref<1x4xf32, #tpu.memory_space<vmem>>, %arg22: memref<32x4xf32, #tpu.memory_space<vmem>>) attributes {dimension_semantics = [#tpu.dimension_semantics<arbitrary>], iteration_bounds = array<i64: 1>, scalar_prefetch = 0 : i64, scratch_operands = 0 : i64, tpu.core_type = #tpu.core_type<tc>, window_params = [{pipeline_mode = #tpu.pipeline_mode<synchronous>, transform_indices = @transform_0, window_bounds = array<i64: 32, 32>}, {pipeline_mode = #tpu.pipeline_mode<synchronous>, transform_indices = @transform_1, window_bounds = array<i64: 1, 16>}, {pipeline_mode = #tpu.pipeline_mode<synchronous>, transform_indices = @transform_2, window_bounds = array<i64: 4, 16>}, {pipeline_mode = #tpu.pipeline_mode<synchronous>, transform_indices = @transform_3, window_bounds = array<i64: 32, 8>}, {pipeline_mode = #tpu.pipeline_mode<synchronous>, transform_indices = @transform_4, window_bounds = array<i64: 8, 8>}, {pipeline_mode = #tpu.pipeline_mode<synchronous>, transform_indices = @transform_5, window_bounds = array<i64: 8, 8>}, {pipeline_mode = #tpu.pipeline_mode<synchronous>, transform_indices = @transform_6, window_bounds = array<i64: 1, 8>}, {pipeline_mode = #tpu.pipeline_mode<synchronous>, transform_indices = @transform_7, window_bounds = array<i64: 32, 8>}, {pipeline_mode = #tpu.pipeline_mode<synchronous>, transform_indices = @transform_8, window_bounds = array<i64: 32, 8>}, {pipeline_mode = #tpu.pipeline_mode<synchronous>, transform_indices = @transform_9, window_bounds = array<i64: 16, 16>}, {pipeline_mode = #tpu.pipeline_mode<synchronous>, transform_indices = @transform_10, window_bounds = array<i64: 16, 16>}, {pipeline_mode = #tpu.pipeline_mode<synchronous>, transform_indices = @transform_11, window_bounds = array<i64: 16, 16>}, {pipeline_mode = #tpu.pipeline_mode<synchronous>, transform_indices = @transform_12, window_bounds = array<i64: 8, 32>}, {pipeline_mode = #tpu.pipeline_mode<synchronous>, transform_indices = @transform_13, window_bounds = array<i64: 32, 256>}, {pipeline_mode = #tpu.pipeline_mode<synchronous>, transform_indices = @transform_14, window_bounds = array<i64: 256, 256>}, {pipeline_mode = #tpu.pipeline_mode<synchronous>, transform_indices = @transform_15, window_bounds = array<i64: 32, 256>}, {pipeline_mode = #tpu.pipeline_mode<synchronous>, transform_indices = @transform_16, window_bounds = array<i64: 1, 256>}, {pipeline_mode = #tpu.pipeline_mode<synchronous>, transform_indices = @transform_17, window_bounds = array<i64: 256, 8>}, {pipeline_mode = #tpu.pipeline_mode<synchronous>, transform_indices = @transform_18, window_bounds = array<i64: 8, 256>}, {pipeline_mode = #tpu.pipeline_mode<synchronous>, transform_indices = @transform_19, window_bounds = array<i64: 256, 4>}, {pipeline_mode = #tpu.pipeline_mode<synchronous>, transform_indices = @transform_20, window_bounds = array<i64: 1, 4>}, {pipeline_mode = #tpu.pipeline_mode<synchronous>, transform_indices = @transform_21, window_bounds = array<i64: 32, 4>}]} {
    %c0 = arith.constant 0 : index
    %c0_0 = arith.constant 0 : index
    %0 = vector.load %arg1[%c0, %c0_0] : memref<32x32xf32, #tpu.memory_space<vmem>>, vector<32x32xf32>
    %c0_1 = arith.constant 0 : index
    %c0_2 = arith.constant 0 : index
    %1 = vector.load %arg2[%c0_1, %c0_2] : memref<1x16xf32, #tpu.memory_space<vmem>>, vector<1x16xf32>
    %c0_3 = arith.constant 0 : index
    %c0_4 = arith.constant 0 : index
    %2 = vector.load %arg3[%c0_3, %c0_4] : memref<4x16xf32, #tpu.memory_space<vmem>>, vector<4x16xf32>
    %c0_5 = arith.constant 0 : index
    %c0_6 = arith.constant 0 : index
    %3 = vector.load %arg4[%c0_5, %c0_6] : memref<32x8xf32, #tpu.memory_space<vmem>>, vector<32x8xf32>
    %c0_7 = arith.constant 0 : index
    %c0_8 = arith.constant 0 : index
    %4 = vector.load %arg5[%c0_7, %c0_8] : memref<8x8xf32, #tpu.memory_space<vmem>>, vector<8x8xf32>
    %c0_9 = arith.constant 0 : index
    %c0_10 = arith.constant 0 : index
    %5 = vector.load %arg6[%c0_9, %c0_10] : memref<8x8xf32, #tpu.memory_space<vmem>>, vector<8x8xf32>
    %c0_11 = arith.constant 0 : index
    %c0_12 = arith.constant 0 : index
    %6 = vector.load %arg7[%c0_11, %c0_12] : memref<1x8xf32, #tpu.memory_space<vmem>>, vector<1x8xf32>
    %c0_13 = arith.constant 0 : index
    %c0_14 = arith.constant 0 : index
    %7 = vector.load %arg8[%c0_13, %c0_14] : memref<32x8xf32, #tpu.memory_space<vmem>>, vector<32x8xf32>
    %c0_15 = arith.constant 0 : index
    %c0_16 = arith.constant 0 : index
    %8 = vector.load %arg9[%c0_15, %c0_16] : memref<32x8xf32, #tpu.memory_space<vmem>>, vector<32x8xf32>
    %c0_17 = arith.constant 0 : index
    %c0_18 = arith.constant 0 : index
    %9 = vector.load %arg10[%c0_17, %c0_18] : memref<16x16xf32, #tpu.memory_space<vmem>>, vector<16x16xf32>
    %c0_19 = arith.constant 0 : index
    %c0_20 = arith.constant 0 : index
    %10 = vector.load %arg11[%c0_19, %c0_20] : memref<16x16xf32, #tpu.memory_space<vmem>>, vector<16x16xf32>
    %c0_21 = arith.constant 0 : index
    %c0_22 = arith.constant 0 : index
    %11 = vector.load %arg12[%c0_21, %c0_22] : memref<16x16xf32, #tpu.memory_space<vmem>>, vector<16x16xf32>
    %c0_23 = arith.constant 0 : index
    %c0_24 = arith.constant 0 : index
    %12 = vector.load %arg13[%c0_23, %c0_24] : memref<8x32xf32, #tpu.memory_space<vmem>>, vector<8x32xf32>
    %13 = vector.extract_strided_slice %0 {offsets = [0, 0], sizes = [16, 32], strides = [1, 1]} : vector<32x32xf32> to vector<16x32xf32>
    %cst = arith.constant dense<0.000000e+00> : vector<1x32xf32>
    %14 = tpu.matmul %1, %13, %cst {dimension_numbers = #tpu.dot_dimension_numbers<[1], [0], [0], [1], [0, 0, 1, 1], [], []>} : vector<1x16xf32>, vector<16x32xf32>, vector<1x32xf32> -> vector<1x32xf32>
    %15 = vector.extract_strided_slice %14 {offsets = [0, 0], sizes = [1, 8], strides = [1, 1]} : vector<1x32xf32> to vector<1x8xf32>
    %16 = vector.extract_strided_slice %14 {offsets = [0, 8], sizes = [1, 8], strides = [1, 1]} : vector<1x32xf32> to vector<1x8xf32>
    %17 = vector.extract_strided_slice %14 {offsets = [0, 16], sizes = [1, 8], strides = [1, 1]} : vector<1x32xf32> to vector<1x8xf32>
    %18 = vector.extract_strided_slice %14 {offsets = [0, 24], sizes = [1, 8], strides = [1, 1]} : vector<1x32xf32> to vector<1x8xf32>
    %19 = tpu.concatenate %15, %16, %17, %18 in 0 : vector<1x8xf32>, vector<1x8xf32>, vector<1x8xf32>, vector<1x8xf32> -> vector<4x8xf32>
    %cst_25 = arith.constant dense<0.000000e+00> : vector<16x8xf32>
    %20 = tpu.matmul %13, %3, %cst_25 {dimension_numbers = #tpu.dot_dimension_numbers<[1], [0], [0], [1], [0, 0, 1, 1], [], []>} : vector<16x32xf32>, vector<32x8xf32>, vector<16x8xf32> -> vector<16x8xf32>
    %cst_26 = arith.constant dense<0.000000e+00> : vector<4x8xf32>
    %21 = tpu.matmul %2, %20, %cst_26 {dimension_numbers = #tpu.dot_dimension_numbers<[1], [0], [0], [1], [0, 0, 1, 1], [], []>} : vector<4x16xf32>, vector<16x8xf32>, vector<4x8xf32> -> vector<4x8xf32>
    %22 = tpu.transpose %19, [1, 0] : vector<4x8xf32> -> vector<8x4xf32>
    %cst_27 = arith.constant dense<0.000000e+00> : vector<8x8xf32>
    %23 = tpu.matmul %22, %21, %cst_27 {dimension_numbers = #tpu.dot_dimension_numbers<[1], [0], [0], [1], [0, 0, 1, 1], [], []>} : vector<8x4xf32>, vector<4x8xf32>, vector<8x8xf32> -> vector<8x8xf32>
    %24 = arith.addf %23, %4 : vector<8x8xf32>
    %25 = arith.negf %24 : vector<8x8xf32>
    %26 = math.exp %25 : vector<8x8xf32>
    %cst_28 = arith.constant 1.000000e+00 : f32
    %27 = vector.broadcast %cst_28 : f32 to vector<8x8xf32>
    %28 = arith.addf %27, %26 : vector<8x8xf32>
    %29 = arith.divf %27, %28 : vector<8x8xf32>
    %cst_29 = arith.constant dense<0.000000e+00> : vector<8x8xf32>
    %30 = tpu.matmul %5, %29, %cst_29 {dimension_numbers = #tpu.dot_dimension_numbers<[1], [0], [0], [1], [0, 0, 1, 1], [], []>} : vector<8x8xf32>, vector<8x8xf32>, vector<8x8xf32> -> vector<8x8xf32>
    %cst_30 = arith.constant dense<0xFF800000> : vector<8xf32>
    %31 = vector.multi_reduction <maximumf>, %30, %cst_30 [0] : vector<8x8xf32> to vector<8xf32>
    %32 = vector.shape_cast %31 : vector<8xf32> to vector<1x8xf32>
    %33 = vector.broadcast %32 : vector<1x8xf32> to vector<8x8xf32>
    %34 = arith.subf %30, %33 : vector<8x8xf32>
    %35 = math.exp %34 : vector<8x8xf32>
    %cst_31 = arith.constant dense<0.000000e+00> : vector<8xf32>
    %36 = vector.multi_reduction <add>, %35, %cst_31 [0] : vector<8x8xf32> to vector<8xf32>
    %37 = vector.shape_cast %36 : vector<8xf32> to vector<1x8xf32>
    %38 = vector.broadcast %37 : vector<1x8xf32> to vector<8x8xf32>
    %39 = arith.divf %35, %38 : vector<8x8xf32>
    %cst_32 = arith.constant dense<0.000000e+00> : vector<1x8xf32>
    %40 = tpu.matmul %6, %39, %cst_32 {dimension_numbers = #tpu.dot_dimension_numbers<[1], [1], [0], [0], [0, 0, 1, 0], [], []>} : vector<1x8xf32>, vector<8x8xf32>, vector<1x8xf32> -> vector<1x8xf32>
    %cst_33 = arith.constant dense<0.000000e+00> : vector<1x32xf32>
    %41 = tpu.matmul %40, %12, %cst_33 {dimension_numbers = #tpu.dot_dimension_numbers<[1], [0], [0], [1], [0, 0, 1, 1], [], []>} : vector<1x8xf32>, vector<8x32xf32>, vector<1x32xf32> -> vector<1x32xf32>
    %42 = vector.broadcast %41 : vector<1x32xf32> to vector<16x32xf32>
    %43 = arith.mulf %13, %42 : vector<16x32xf32>
    %cst_34 = arith.constant dense<0.000000e+00> : vector<16x8xf32>
    %44 = tpu.matmul %43, %7, %cst_34 {dimension_numbers = #tpu.dot_dimension_numbers<[1], [0], [0], [1], [0, 0, 1, 1], [], []>} : vector<16x32xf32>, vector<32x8xf32>, vector<16x8xf32> -> vector<16x8xf32>
    %cst_35 = arith.constant dense<0.000000e+00> : vector<16x8xf32>
    %45 = tpu.matmul %13, %8, %cst_35 {dimension_numbers = #tpu.dot_dimension_numbers<[1], [0], [0], [1], [0, 0, 1, 1], [], []>} : vector<16x32xf32>, vector<32x8xf32>, vector<16x8xf32> -> vector<16x8xf32>
    %cst_36 = arith.constant dense<0.000000e+00> : vector<16x8xf32>
    %46 = tpu.matmul %45, %39, %cst_36 {dimension_numbers = #tpu.dot_dimension_numbers<[1], [0], [0], [1], [0, 0, 1, 1], [], []>} : vector<16x8xf32>, vector<8x8xf32>, vector<16x8xf32> -> vector<16x8xf32>
    %cst_37 = arith.constant dense<0.000000e+00> : vector<16x16xf32>
    %47 = tpu.matmul %44, %46, %cst_37 {dimension_numbers = #tpu.dot_dimension_numbers<[1], [1], [0], [0], [0, 0, 1, 0], [], []>} : vector<16x8xf32>, vector<16x8xf32>, vector<16x16xf32> -> vector<16x16xf32>
    %48 = arith.addf %47, %9 : vector<16x16xf32>
    %49 = arith.negf %48 : vector<16x16xf32>
    %50 = math.exp %49 : vector<16x16xf32>
    %cst_38 = arith.constant 1.000000e+00 : f32
    %51 = vector.broadcast %cst_38 : f32 to vector<16x16xf32>
    %52 = arith.addf %51, %50 : vector<16x16xf32>
    %53 = arith.divf %51, %52 : vector<16x16xf32>
    %cst_39 = arith.constant dense<0.000000e+00> : vector<16x16xf32>
    %54 = tpu.matmul %10, %53, %cst_39 {dimension_numbers = #tpu.dot_dimension_numbers<[1], [0], [0], [1], [0, 0, 1, 1], [], []>} : vector<16x16xf32>, vector<16x16xf32>, vector<16x16xf32> -> vector<16x16xf32>
    %cst_40 = arith.constant dense<0xFF800000> : vector<16xf32>
    %55 = vector.multi_reduction <maximumf>, %54, %cst_40 [0] : vector<16x16xf32> to vector<16xf32>
    %56 = vector.shape_cast %55 : vector<16xf32> to vector<1x16xf32>
    %57 = vector.broadcast %56 : vector<1x16xf32> to vector<16x16xf32>
    %58 = arith.subf %54, %57 : vector<16x16xf32>
    %59 = math.exp %58 : vector<16x16xf32>
    %cst_41 = arith.constant dense<0.000000e+00> : vector<16xf32>
    %60 = vector.multi_reduction <add>, %59, %cst_41 [0] : vector<16x16xf32> to vector<16xf32>
    %61 = vector.shape_cast %60 : vector<16xf32> to vector<1x16xf32>
    %62 = vector.broadcast %61 : vector<1x16xf32> to vector<16x16xf32>
    %63 = arith.divf %59, %62 : vector<16x16xf32>
    %64 = arith.mulf %63, %11 : vector<16x16xf32>
    %cst_42 = arith.constant dense<0.000000e+00> : vector<16x32xf32>
    %65 = tpu.matmul %64, %13, %cst_42 {dimension_numbers = #tpu.dot_dimension_numbers<[1], [0], [0], [1], [0, 0, 1, 1], [], []>} : vector<16x16xf32>, vector<16x32xf32>, vector<16x32xf32> -> vector<16x32xf32>
    %66 = vector.extract_strided_slice %0 {offsets = [16, 0], sizes = [16, 32], strides = [1, 1]} : vector<32x32xf32> to vector<16x32xf32>
    %cst_43 = arith.constant dense<0.000000e+00> : vector<1x32xf32>
    %67 = tpu.matmul %1, %66, %cst_43 {dimension_numbers = #tpu.dot_dimension_numbers<[1], [0], [0], [1], [0, 0, 1, 1], [], []>} : vector<1x16xf32>, vector<16x32xf32>, vector<1x32xf32> -> vector<1x32xf32>
    %68 = vector.extract_strided_slice %67 {offsets = [0, 0], sizes = [1, 8], strides = [1, 1]} : vector<1x32xf32> to vector<1x8xf32>
    %69 = vector.extract_strided_slice %67 {offsets = [0, 8], sizes = [1, 8], strides = [1, 1]} : vector<1x32xf32> to vector<1x8xf32>
    %70 = vector.extract_strided_slice %67 {offsets = [0, 16], sizes = [1, 8], strides = [1, 1]} : vector<1x32xf32> to vector<1x8xf32>
    %71 = vector.extract_strided_slice %67 {offsets = [0, 24], sizes = [1, 8], strides = [1, 1]} : vector<1x32xf32> to vector<1x8xf32>
    %72 = tpu.concatenate %68, %69, %70, %71 in 0 : vector<1x8xf32>, vector<1x8xf32>, vector<1x8xf32>, vector<1x8xf32> -> vector<4x8xf32>
    %cst_44 = arith.constant dense<0.000000e+00> : vector<16x8xf32>
    %73 = tpu.matmul %66, %3, %cst_44 {dimension_numbers = #tpu.dot_dimension_numbers<[1], [0], [0], [1], [0, 0, 1, 1], [], []>} : vector<16x32xf32>, vector<32x8xf32>, vector<16x8xf32> -> vector<16x8xf32>
    %cst_45 = arith.constant dense<0.000000e+00> : vector<4x8xf32>
    %74 = tpu.matmul %2, %73, %cst_45 {dimension_numbers = #tpu.dot_dimension_numbers<[1], [0], [0], [1], [0, 0, 1, 1], [], []>} : vector<4x16xf32>, vector<16x8xf32>, vector<4x8xf32> -> vector<4x8xf32>
    %75 = tpu.transpose %72, [1, 0] : vector<4x8xf32> -> vector<8x4xf32>
    %cst_46 = arith.constant dense<0.000000e+00> : vector<8x8xf32>
    %76 = tpu.matmul %75, %74, %cst_46 {dimension_numbers = #tpu.dot_dimension_numbers<[1], [0], [0], [1], [0, 0, 1, 1], [], []>} : vector<8x4xf32>, vector<4x8xf32>, vector<8x8xf32> -> vector<8x8xf32>
    %77 = arith.addf %76, %4 : vector<8x8xf32>
    %78 = arith.negf %77 : vector<8x8xf32>
    %79 = math.exp %78 : vector<8x8xf32>
    %cst_47 = arith.constant 1.000000e+00 : f32
    %80 = vector.broadcast %cst_47 : f32 to vector<8x8xf32>
    %81 = arith.addf %80, %79 : vector<8x8xf32>
    %82 = arith.divf %80, %81 : vector<8x8xf32>
    %cst_48 = arith.constant dense<0.000000e+00> : vector<8x8xf32>
    %83 = tpu.matmul %5, %82, %cst_48 {dimension_numbers = #tpu.dot_dimension_numbers<[1], [0], [0], [1], [0, 0, 1, 1], [], []>} : vector<8x8xf32>, vector<8x8xf32>, vector<8x8xf32> -> vector<8x8xf32>
    %cst_49 = arith.constant dense<0xFF800000> : vector<8xf32>
    %84 = vector.multi_reduction <maximumf>, %83, %cst_49 [0] : vector<8x8xf32> to vector<8xf32>
    %85 = vector.shape_cast %84 : vector<8xf32> to vector<1x8xf32>
    %86 = vector.broadcast %85 : vector<1x8xf32> to vector<8x8xf32>
    %87 = arith.subf %83, %86 : vector<8x8xf32>
    %88 = math.exp %87 : vector<8x8xf32>
    %cst_50 = arith.constant dense<0.000000e+00> : vector<8xf32>
    %89 = vector.multi_reduction <add>, %88, %cst_50 [0] : vector<8x8xf32> to vector<8xf32>
    %90 = vector.shape_cast %89 : vector<8xf32> to vector<1x8xf32>
    %91 = vector.broadcast %90 : vector<1x8xf32> to vector<8x8xf32>
    %92 = arith.divf %88, %91 : vector<8x8xf32>
    %cst_51 = arith.constant dense<0.000000e+00> : vector<1x8xf32>
    %93 = tpu.matmul %6, %92, %cst_51 {dimension_numbers = #tpu.dot_dimension_numbers<[1], [1], [0], [0], [0, 0, 1, 0], [], []>} : vector<1x8xf32>, vector<8x8xf32>, vector<1x8xf32> -> vector<1x8xf32>
    %cst_52 = arith.constant dense<0.000000e+00> : vector<1x32xf32>
    %94 = tpu.matmul %93, %12, %cst_52 {dimension_numbers = #tpu.dot_dimension_numbers<[1], [0], [0], [1], [0, 0, 1, 1], [], []>} : vector<1x8xf32>, vector<8x32xf32>, vector<1x32xf32> -> vector<1x32xf32>
    %95 = vector.broadcast %94 : vector<1x32xf32> to vector<16x32xf32>
    %96 = arith.mulf %66, %95 : vector<16x32xf32>
    %cst_53 = arith.constant dense<0.000000e+00> : vector<16x8xf32>
    %97 = tpu.matmul %96, %7, %cst_53 {dimension_numbers = #tpu.dot_dimension_numbers<[1], [0], [0], [1], [0, 0, 1, 1], [], []>} : vector<16x32xf32>, vector<32x8xf32>, vector<16x8xf32> -> vector<16x8xf32>
    %cst_54 = arith.constant dense<0.000000e+00> : vector<16x8xf32>
    %98 = tpu.matmul %66, %8, %cst_54 {dimension_numbers = #tpu.dot_dimension_numbers<[1], [0], [0], [1], [0, 0, 1, 1], [], []>} : vector<16x32xf32>, vector<32x8xf32>, vector<16x8xf32> -> vector<16x8xf32>
    %cst_55 = arith.constant dense<0.000000e+00> : vector<16x8xf32>
    %99 = tpu.matmul %98, %92, %cst_55 {dimension_numbers = #tpu.dot_dimension_numbers<[1], [0], [0], [1], [0, 0, 1, 1], [], []>} : vector<16x8xf32>, vector<8x8xf32>, vector<16x8xf32> -> vector<16x8xf32>
    %cst_56 = arith.constant dense<0.000000e+00> : vector<16x16xf32>
    %100 = tpu.matmul %97, %99, %cst_56 {dimension_numbers = #tpu.dot_dimension_numbers<[1], [1], [0], [0], [0, 0, 1, 0], [], []>} : vector<16x8xf32>, vector<16x8xf32>, vector<16x16xf32> -> vector<16x16xf32>
    %101 = arith.addf %100, %9 : vector<16x16xf32>
    %102 = arith.negf %101 : vector<16x16xf32>
    %103 = math.exp %102 : vector<16x16xf32>
    %cst_57 = arith.constant 1.000000e+00 : f32
    %104 = vector.broadcast %cst_57 : f32 to vector<16x16xf32>
    %105 = arith.addf %104, %103 : vector<16x16xf32>
    %106 = arith.divf %104, %105 : vector<16x16xf32>
    %cst_58 = arith.constant dense<0.000000e+00> : vector<16x16xf32>
    %107 = tpu.matmul %10, %106, %cst_58 {dimension_numbers = #tpu.dot_dimension_numbers<[1], [0], [0], [1], [0, 0, 1, 1], [], []>} : vector<16x16xf32>, vector<16x16xf32>, vector<16x16xf32> -> vector<16x16xf32>
    %cst_59 = arith.constant dense<0xFF800000> : vector<16xf32>
    %108 = vector.multi_reduction <maximumf>, %107, %cst_59 [0] : vector<16x16xf32> to vector<16xf32>
    %109 = vector.shape_cast %108 : vector<16xf32> to vector<1x16xf32>
    %110 = vector.broadcast %109 : vector<1x16xf32> to vector<16x16xf32>
    %111 = arith.subf %107, %110 : vector<16x16xf32>
    %112 = math.exp %111 : vector<16x16xf32>
    %cst_60 = arith.constant dense<0.000000e+00> : vector<16xf32>
    %113 = vector.multi_reduction <add>, %112, %cst_60 [0] : vector<16x16xf32> to vector<16xf32>
    %114 = vector.shape_cast %113 : vector<16xf32> to vector<1x16xf32>
    %115 = vector.broadcast %114 : vector<1x16xf32> to vector<16x16xf32>
    %116 = arith.divf %112, %115 : vector<16x16xf32>
    %117 = arith.mulf %116, %11 : vector<16x16xf32>
    %cst_61 = arith.constant dense<0.000000e+00> : vector<16x32xf32>
    %118 = tpu.matmul %117, %66, %cst_61 {dimension_numbers = #tpu.dot_dimension_numbers<[1], [0], [0], [1], [0, 0, 1, 1], [], []>} : vector<16x16xf32>, vector<16x32xf32>, vector<16x32xf32> -> vector<16x32xf32>
    %119 = tpu.concatenate %65, %118 in 0 : vector<16x32xf32>, vector<16x32xf32> -> vector<32x32xf32>
    %120 = arith.truncf %119 : vector<32x32xf32> to vector<32x32xbf16>
    %c0_62 = arith.constant 0 : index
    %c0_63 = arith.constant 0 : index
    %121 = vector.load %arg14[%c0_62, %c0_63] : memref<32x256xbf16, #tpu.memory_space<vmem>>, vector<32x256xbf16>
    %cst_64 = arith.constant dense<0.000000e+00> : vector<32x256xf32>
    %122 = tpu.matmul %120, %121, %cst_64 {dimension_numbers = #tpu.dot_dimension_numbers<[1], [0], [0], [1], [0, 0, 1, 1], [], []>} : vector<32x32xbf16>, vector<32x256xbf16>, vector<32x256xf32> -> vector<32x256xf32>
    %cst_65 = arith.constant 0.000000e+00 : f32
    %123 = vector.broadcast %cst_65 : f32 to vector<32x256xf32>
    %124 = arith.maximumf %122, %123 : vector<32x256xf32>
    %125 = arith.truncf %124 : vector<32x256xf32> to vector<32x256xbf16>
    %c0_66 = arith.constant 0 : index
    %c0_67 = arith.constant 0 : index
    %126 = vector.load %arg15[%c0_66, %c0_67] : memref<256x256xbf16, #tpu.memory_space<vmem>>, vector<256x256xbf16>
    %cst_68 = arith.constant dense<0.000000e+00> : vector<32x256xf32>
    %127 = tpu.matmul %125, %126, %cst_68 {dimension_numbers = #tpu.dot_dimension_numbers<[1], [0], [0], [1], [0, 0, 1, 1], [], []>} : vector<32x256xbf16>, vector<256x256xbf16>, vector<32x256xf32> -> vector<32x256xf32>
    %128 = arith.truncf %0 : vector<32x32xf32> to vector<32x32xbf16>
    %c0_69 = arith.constant 0 : index
    %c0_70 = arith.constant 0 : index
    %129 = vector.load %arg16[%c0_69, %c0_70] : memref<32x256xbf16, #tpu.memory_space<vmem>>, vector<32x256xbf16>
    %cst_71 = arith.constant dense<0.000000e+00> : vector<32x256xf32>
    %130 = tpu.matmul %128, %129, %cst_71 {dimension_numbers = #tpu.dot_dimension_numbers<[1], [0], [0], [1], [0, 0, 1, 1], [], []>} : vector<32x32xbf16>, vector<32x256xbf16>, vector<32x256xf32> -> vector<32x256xf32>
    %131 = arith.addf %127, %130 : vector<32x256xf32>
    %c0_72 = arith.constant 0 : index
    %c0_73 = arith.constant 0 : index
    %132 = vector.load %arg17[%c0_72, %c0_73] : memref<1x256xf32, #tpu.memory_space<vmem>>, vector<1x256xf32>
    %133 = vector.broadcast %132 : vector<1x256xf32> to vector<32x256xf32>
    %134 = arith.addf %131, %133 : vector<32x256xf32>
    %cst_74 = arith.constant 0.000000e+00 : f32
    %135 = vector.broadcast %cst_74 : f32 to vector<32x256xf32>
    %136 = arith.maximumf %134, %135 : vector<32x256xf32>
    %c0_75 = arith.constant 0 : index
    %c0_76 = arith.constant 0 : index
    %137 = vector.load %arg18[%c0_75, %c0_76] : memref<256x8xf32, #tpu.memory_space<vmem>>, vector<256x8xf32>
    %cst_77 = arith.constant dense<0.000000e+00> : vector<32x8xf32>
    %138 = tpu.matmul %136, %137, %cst_77 {dimension_numbers = #tpu.dot_dimension_numbers<[1], [0], [0], [1], [0, 0, 1, 1], [], []>} : vector<32x256xf32>, vector<256x8xf32>, vector<32x8xf32> -> vector<32x8xf32>
    %c0_78 = arith.constant 0 : index
    %c0_79 = arith.constant 0 : index
    %139 = vector.load %arg19[%c0_78, %c0_79] : memref<8x256xf32, #tpu.memory_space<vmem>>, vector<8x256xf32>
    %cst_80 = arith.constant dense<0.000000e+00> : vector<32x256xf32>
    %140 = tpu.matmul %138, %139, %cst_80 {dimension_numbers = #tpu.dot_dimension_numbers<[1], [0], [0], [1], [0, 0, 1, 1], [], []>} : vector<32x8xf32>, vector<8x256xf32>, vector<32x256xf32> -> vector<32x256xf32>
    %141 = arith.subf %136, %140 : vector<32x256xf32>
    %142 = arith.mulf %141, %141 : vector<32x256xf32>
    %c0_81 = arith.constant 0 : index
    %c0_82 = arith.constant 0 : index
    %143 = vector.load %arg18[%c0_81, %c0_82] : memref<256x8xf32, #tpu.memory_space<vmem>>, vector<256x8xf32>
    %cst_83 = arith.constant dense<0.000000e+00> : vector<32x8xf32>
    %144 = tpu.matmul %142, %143, %cst_83 {dimension_numbers = #tpu.dot_dimension_numbers<[1], [0], [0], [1], [0, 0, 1, 1], [], []>} : vector<32x256xf32>, vector<256x8xf32>, vector<32x8xf32> -> vector<32x8xf32>
    %c0_84 = arith.constant 0 : index
    %c0_85 = arith.constant 0 : index
    %145 = vector.load %arg19[%c0_84, %c0_85] : memref<8x256xf32, #tpu.memory_space<vmem>>, vector<8x256xf32>
    %cst_86 = arith.constant dense<0.000000e+00> : vector<32x256xf32>
    %146 = tpu.matmul %144, %145, %cst_86 {dimension_numbers = #tpu.dot_dimension_numbers<[1], [0], [0], [1], [0, 0, 1, 1], [], []>} : vector<32x8xf32>, vector<8x256xf32>, vector<32x256xf32> -> vector<32x256xf32>
    %cst_87 = arith.constant 9.99999974E-6 : f32
    %147 = vector.broadcast %cst_87 : f32 to vector<32x256xf32>
    %148 = arith.addf %146, %147 : vector<32x256xf32>
    %149 = math.rsqrt %148 : vector<32x256xf32>
    %150 = arith.mulf %141, %149 : vector<32x256xf32>
    %151 = arith.truncf %150 : vector<32x256xf32> to vector<32x256xbf16>
    %c0_88 = arith.constant 0 : index
    %c0_89 = arith.constant 0 : index
    %152 = vector.load %arg20[%c0_88, %c0_89] : memref<256x4xbf16, #tpu.memory_space<vmem>>, vector<256x4xbf16>
    %cst_90 = arith.constant dense<0.000000e+00> : vector<32x4xf32>
    %153 = tpu.matmul %151, %152, %cst_90 {dimension_numbers = #tpu.dot_dimension_numbers<[1], [0], [0], [1], [0, 0, 1, 1], [], []>} : vector<32x256xbf16>, vector<256x4xbf16>, vector<32x4xf32> -> vector<32x4xf32>
    %c0_91 = arith.constant 0 : index
    %c0_92 = arith.constant 0 : index
    %154 = vector.load %arg21[%c0_91, %c0_92] : memref<1x4xf32, #tpu.memory_space<vmem>>, vector<1x4xf32>
    %155 = vector.broadcast %154 : vector<1x4xf32> to vector<32x4xf32>
    %156 = arith.addf %153, %155 : vector<32x4xf32>
    %c0_93 = arith.constant 0 : index
    %c0_94 = arith.constant 0 : index
    %157 = vector.load %arg22[%c0_93, %c0_94] : memref<32x4xf32, #tpu.memory_space<vmem>>, vector<32x4xf32>
    tpu.vector_store %arg22[%c0_93, %c0_94], %156 {strides = array<i32>} : memref<32x4xf32, #tpu.memory_space<vmem>>, vector<32x4xf32>,
    return
  }
  func.func @transform_0(%arg0: i32) -> (i32, i32) {
    %c0_i32 = arith.constant 0 : i32
    %c0_i32_0 = arith.constant 0 : i32
    %c0_i32_1 = arith.constant 0 : i32
    return %c0_i32, %c0_i32_0 : i32, i32
  }
  func.func @transform_1(%arg0: i32) -> (i32, i32) {
    %c0_i32 = arith.constant 0 : i32
    %c0_i32_0 = arith.constant 0 : i32
    %c0_i32_1 = arith.constant 0 : i32
    return %c0_i32, %c0_i32_0 : i32, i32
  }
  func.func @transform_2(%arg0: i32) -> (i32, i32) {
    %c0_i32 = arith.constant 0 : i32
    %c0_i32_0 = arith.constant 0 : i32
    %c0_i32_1 = arith.constant 0 : i32
    return %c0_i32, %c0_i32_0 : i32, i32
  }
  func.func @transform_3(%arg0: i32) -> (i32, i32) {
    %c0_i32 = arith.constant 0 : i32
    %c0_i32_0 = arith.constant 0 : i32
    %c0_i32_1 = arith.constant 0 : i32
    return %c0_i32, %c0_i32_0 : i32, i32
  }
  func.func @transform_4(%arg0: i32) -> (i32, i32) {
    %c0_i32 = arith.constant 0 : i32
    %c0_i32_0 = arith.constant 0 : i32
    %c0_i32_1 = arith.constant 0 : i32
    return %c0_i32, %c0_i32_0 : i32, i32
  }
  func.func @transform_5(%arg0: i32) -> (i32, i32) {
    %c0_i32 = arith.constant 0 : i32
    %c0_i32_0 = arith.constant 0 : i32
    %c0_i32_1 = arith.constant 0 : i32
    return %c0_i32, %c0_i32_0 : i32, i32
  }
  func.func @transform_6(%arg0: i32) -> (i32, i32) {
    %c0_i32 = arith.constant 0 : i32
    %c0_i32_0 = arith.constant 0 : i32
    %c0_i32_1 = arith.constant 0 : i32
    return %c0_i32, %c0_i32_0 : i32, i32
  }
  func.func @transform_7(%arg0: i32) -> (i32, i32) {
    %c0_i32 = arith.constant 0 : i32
    %c0_i32_0 = arith.constant 0 : i32
    %c0_i32_1 = arith.constant 0 : i32
    return %c0_i32, %c0_i32_0 : i32, i32
  }
  func.func @transform_8(%arg0: i32) -> (i32, i32) {
    %c0_i32 = arith.constant 0 : i32
    %c0_i32_0 = arith.constant 0 : i32
    %c0_i32_1 = arith.constant 0 : i32
    return %c0_i32, %c0_i32_0 : i32, i32
  }
  func.func @transform_9(%arg0: i32) -> (i32, i32) {
    %c0_i32 = arith.constant 0 : i32
    %c0_i32_0 = arith.constant 0 : i32
    %c0_i32_1 = arith.constant 0 : i32
    return %c0_i32, %c0_i32_0 : i32, i32
  }
  func.func @transform_10(%arg0: i32) -> (i32, i32) {
    %c0_i32 = arith.constant 0 : i32
    %c0_i32_0 = arith.constant 0 : i32
    %c0_i32_1 = arith.constant 0 : i32
    return %c0_i32, %c0_i32_0 : i32, i32
  }
  func.func @transform_11(%arg0: i32) -> (i32, i32) {
    %c0_i32 = arith.constant 0 : i32
    %c0_i32_0 = arith.constant 0 : i32
    %c0_i32_1 = arith.constant 0 : i32
    return %c0_i32, %c0_i32_0 : i32, i32
  }
  func.func @transform_12(%arg0: i32) -> (i32, i32) {
    %c0_i32 = arith.constant 0 : i32
    %c0_i32_0 = arith.constant 0 : i32
    %c0_i32_1 = arith.constant 0 : i32
    return %c0_i32, %c0_i32_0 : i32, i32
  }
  func.func @transform_13(%arg0: i32) -> (i32, i32) {
    %c0_i32 = arith.constant 0 : i32
    %c0_i32_0 = arith.constant 0 : i32
    %c0_i32_1 = arith.constant 0 : i32
    return %c0_i32, %c0_i32_0 : i32, i32
  }
  func.func @transform_14(%arg0: i32) -> (i32, i32) {
    %c0_i32 = arith.constant 0 : i32
    %c0_i32_0 = arith.constant 0 : i32
    %c0_i32_1 = arith.constant 0 : i32
    return %c0_i32, %c0_i32_0 : i32, i32
  }
  func.func @transform_15(%arg0: i32) -> (i32, i32) {
    %c0_i32 = arith.constant 0 : i32
    %c0_i32_0 = arith.constant 0 : i32
    %c0_i32_1 = arith.constant 0 : i32
    return %c0_i32, %c0_i32_0 : i32, i32
  }
  func.func @transform_16(%arg0: i32) -> (i32, i32) {
    %c0_i32 = arith.constant 0 : i32
    %c0_i32_0 = arith.constant 0 : i32
    %c0_i32_1 = arith.constant 0 : i32
    return %c0_i32, %c0_i32_0 : i32, i32
  }
  func.func @transform_17(%arg0: i32) -> (i32, i32) {
    %c0_i32 = arith.constant 0 : i32
    %c0_i32_0 = arith.constant 0 : i32
    %c0_i32_1 = arith.constant 0 : i32
    return %c0_i32, %c0_i32_0 : i32, i32
  }
  func.func @transform_18(%arg0: i32) -> (i32, i32) {
    %c0_i32 = arith.constant 0 : i32
    %c0_i32_0 = arith.constant 0 : i32
    %c0_i32_1 = arith.constant 0 : i32
    return %c0_i32, %c0_i32_0 : i32, i32
  }
  func.func @transform_19(%arg0: i32) -> (i32, i32) {
    %c0_i32 = arith.constant 0 : i32
    %c0_i32_0 = arith.constant 0 : i32
    %c0_i32_1 = arith.constant 0 : i32
    return %c0_i32, %c0_i32_0 : i32, i32
  }
  func.func @transform_20(%arg0: i32) -> (i32, i32) {
    %c0_i32 = arith.constant 0 : i32
    %c0_i32_0 = arith.constant 0 : i32
    %c0_i32_1 = arith.constant 0 : i32
    return %c0_i32, %c0_i32_0 : i32, i32
  }
  func.func @transform_21(%arg0: i32) -> (i32, i32) {
    %c0_i32 = arith.constant 0 : i32
    %c0_i32_0 = arith.constant 0 : i32
    %c0_i32_1 = arith.constant 0 : i32
    return %c0_i32, %c0_i32_0 : i32, i32
  }
}

</mosaic_0001>

<bundles_post_ra>
// kernel: tpu_custom_call.1
= control target key start
LH: loop header
LB: loop body
LE: loop exit
PB: predicated region body
PF: predicated region fallthrough
CT: control target
= control target key end

     0   :  { %v4260_v0 = vmov 0.0|0.0   ;;  %vm4261_vm0 = vmmov 0   ;;  %v4262_v3 = vmov 0.0   ;;  %vm190_vm1 = vcmask 261120   ;;  %s4263_s27 = smov 104   ;;  %s4265_s28 = smov 112   ;;  %s5179_s0 = inlined_call_operand.vmem [shape: f32[32,32], index: 0, kind: input, shape index: {}]   ;;  %s5180_s3 = inlined_call_operand.vmem [shape: f32[32,8], index: 3, kind: input, shape index: {}]   ;;  %s5181_s1 = inlined_call_operand.vmem [shape: f32[1,16], index: 1, kind: input, shape index: {}]   ;;  %s5182_s2 = inlined_call_operand.vmem [shape: f32[4,16], index: 2, kind: input, shape index: {}]   ;;  %s5183_s4 = inlined_call_operand.vmem [shape: f32[8,8], index: 4, kind: input, shape index: {}]   ;;  %s5184_s5 = inlined_call_operand.vmem [shape: f32[8,8], index: 5, kind: input, shape index: {}]   ;;  %s5185_s12 = inlined_call_operand.vmem [shape: f32[8,32], index: 12, kind: input, shape index: {}]   ;;  %s5186_s7 = inlined_call_operand.vmem [shape: f32[32,8], index: 7, kind: input, shape index: {}]   ;;  %s5187_s6 = inlined_call_operand.vmem [shape: f32[1,8], index: 6, kind: input, shape index: {}]   ;;  %s5188_s8 = inlined_call_operand.vmem [shape: f32[32,8], index: 8, kind: input, shape index: {}]   ;;  %s5189_s10 = inlined_call_operand.vmem [shape: f32[16,16], index: 10, kind: input, shape index: {}]   ;;  %s5190_s9 = inlined_call_operand.vmem [shape: f32[16,16], index: 9, kind: input, shape index: {}]   ;;  %s5191_s11 = inlined_call_operand.vmem [shape: f32[16,16], index: 11, kind: input, shape index: {}]   ;;  %s5192_s13 = inlined_call_operand.vmem [shape: bf16[32,256], index: 13, kind: input, shape index: {}]   ;;  %s5193_s15 = inlined_call_operand.vmem [shape: bf16[32,256], index: 15, kind: input, shape index: {}]   ;;  %s5194_s14 = inlined_call_operand.vmem [shape: bf16[256,256], index: 14, kind: input, shape index: {}]   ;;  %s5195_s17 = inlined_call_operand.vmem [shape: f32[256,8], index: 17, kind: input, shape index: {}]   ;;  %s5196_s16 = inlined_call_operand.vmem [shape: f32[1,256], index: 16, kind: input, shape index: {}]   ;;  %s5197_s18 = inlined_call_operand.vmem [shape: f32[8,256], index: 18, kind: input, shape index: {}]   ;;  %s5198_s19 = inlined_call_operand.vmem [shape: bf16[256,4], index: 19, kind: input, shape index: {}]   ;;  %s5199_s20 = inlined_call_operand.vmem [shape: f32[1,4], index: 20, kind: input, shape index: {}]   ;;  %s5200_s21 = inlined_call_operand.vmem [shape: f32[32,4], index: 21, kind: output, shape index: {}]  }
   0x1   :  { %5203 = sst [smem:[#allocation2_spill]] %s5179_s0  ;;  %3957 = vmatprep.subr.bf16.mxu0 %v4260_v0  ;;  %3775 = vmatprep.mubr.msk.f32.mxu0 %vm4261_vm0, %v4262_v3  ;;  %vm97_vm2 = vcmask 130048   ;;  %vm184_vm3 = vcmask 1040384   ;;  %vm186_vm4 = vcmask 1041408   ;;  %vm188_vm5 = vcmask 1042432   ;;  %v4472_v39 = vld [vmem:[%s5185_s12] sm:$0xff] }
   0x2   :  { %5204 = sst [smem:[#allocation3_spill]] %s5180_s3  ;;  %s5209_s26 = sld [smem:[#allocation2_spill]]  ;;  %vm381_vm6 = vcmask 1043456   ;;  %vm377_vm7 = vcmask 31744   ;;  %vm461_vm8 = vcmask 64512   ;;  %v82_v59 = vld [vmem:[%s5186_s7] sm:$0xff] }
   0x3   :  { %5205 = sst [smem:[#allocation4_spill]] %s5181_s1  ;;  %s5210_s0 = sld [smem:[#allocation3_spill]]  ;;  %v83_v60 = vld [vmem:[%s5186_s7 + $0x8] sm:$0xff]  ;;  %vm4545_vm9 = vmpackc.low %vm461_vm8, %vm461_vm8 }
   0x4   :  { %5206 = sst [smem:[#allocation5_spill]] %s5182_s2  ;;  %s5211_s25 = sld [smem:[#allocation4_spill]]  ;;  %v4483_v62 = vpack.c.bf16 %v83_v60, %v82_v59 }
   0x5   :  { %5207 = sst [smem:[#allocation6_spill]] %s5183_s4  ;;  %s4264_s2 = smov 120  }
   0x6   :  { %5208 = sst [smem:[#allocation7_spill]] %s5184_s5  ;;  %s5212_s4 = sld [smem:[#allocation5_spill]] }
   0x7   :  { %s5213_s22 = sld [smem:[#allocation6_spill]]  ;;  %s5214_s24 = sld [smem:[#allocation7_spill]] }
   0x8   :  { %v4381_v1 = vld [vmem:[%s5209_s26] sm:$0xff]  ;;  %v4386_v2 = vld [vmem:[%s5209_s26 + $0x8] sm:$0xff] }
   0x9   :  { %v4392_v4 = vpack.c.bf16 %v4386_v2, %v4381_v1  ;;  %v75_v5 = vld [vmem:[%s5210_s0] sm:$0xff]  ;;  %v76_v6 = vld [vmem:[%s5210_s0 + $0x8] sm:$0xff]  ;;  %v77_v7 = vld [vmem:[%s5210_s0 + $0x10] sm:$0xff]  ;;  %3786 = vmatprep.mubr.msk.f32.mxu1 %vm190_vm1, %v4381_v1 }
   0xa   :  { %v4405_v8 = vpack.c.bf16 %v76_v6, %v75_v5  ;;  %v78_v9 = vld [vmem:[%s5210_s0 + $0x18] sm:$0xff]  ;;  %v4414_v10 = vld [vmem:[%s5211_s25] sm:$0x1]  ;;  %v84_v5 = vld [vmem:[%s5186_s7 + $0x10] sm:$0xff] }
   0xb   :  { %3959 = vmatpush3.bf16.msra.mxu0 %v4392_v4  ;;  %v4416_v11 = vpack.c.bf16 %v78_v9, %v77_v7  ;;  %v85_v6 = vld [vmem:[%s5186_s7 + $0x18] sm:$0xff]  ;;  %v4495_v7 = vld [vmem:[%s5187_s6] sm:$0x1] }
   0xc   :  { %3961 = vmatprep.subr.bf16.mxu1 %v4405_v8  ;;  %3968 = vmatprep.subr.bf16.mxu0 %v4260_v0  ;;  %v4438_v20 = vld [vmem:[%s5212_s4] sm:$0xf]  ;;  %v4498_v9 = vpack.c.bf16 %v85_v6, %v84_v5 }
   0xd   :  { %3963 = vmatpush3.bf16.msra.mxu1 %v4405_v8  ;;  %v4456_v30 = vld [vmem:[%s5213_s22] sm:$0xff] }
   0xe   :  { %3776 = vmatmul.mubr.msk.f32.vlgmr.msra.gmra.mrb[0].mxu0 %vm97_vm2, %v4414_v10  ;;  %3965 = vmatprep.subr.bf16.mxu1 %v4416_v11  ;;  %v4462_v37 = vld [vmem:[%s5214_s24] sm:$0xff] }
   0xf   :  { %3793 = vmatprep.mubr.msk.f32.mxu0 %vm4261_vm0, %v4262_v3 }
  0x11   :  { %3967 = vmatpush3.bf16.msra.mxu1 %v4416_v11 }
  0x12   :  { %3801 = vmatprep.subr.mxu1 %v4262_v3 }
  0x14   :  { %3787 = vmatmul.mubr.msk.f32.vlgmr.msra.gmra.mrb[0].mxu1 %vm190_vm1, %v4386_v2 }
  0x15   :  { %3803 = vmatprep.mubr.msk.f32.mxu1 %vm4261_vm0, %v4262_v3 }
  0xe1   :  { %v167_v12 = vpop.f32.mrb[0].mxu0 }
  0xe2   :  { %v3777_v13 = vpop.f32.mrb[1].mxu0  ;;  %v180_v14 = vrot.slane %v167_v12, 5  ;;  %v172_v15 = vrot.slane %v167_v12, 7  ;;  %v176_v16 = vrot.slane %v167_v12, 6 }
  0xe3   :  { %v87_v13 = vld [vmem:[%s5188_s8 + $0x8] sm:$0xff] }
  0xe4   :  { %181 = vrot.lane.b32.xlu1 %v180_v14, %s4263_s27  ;;  %173 = vrot.lane.b32.xlu0 %v172_v15, %s4264_s2  ;;  %v88_v15 = vld [vmem:[%s5188_s8 + $0x10] sm:$0xff] }
  0xe7   :  { %v3788_v17 = vpop.f32.mrb[0].mxu1 }
  0xe8   :  { %177 = vrot.lane.b32.xlu0 %v176_v16, %s4265_s28  ;;  %v263_v18 = vpop.f32.mrb[1].mxu1  ;;  %v89_v16 = vld [vmem:[%s5188_s8 + $0x18] sm:$0xff] }
  0xe9   :  { %v3969_v19 = vpack.c.bf16 %v3788_v17, %v263_v18  ;;  %v4520_v17 = vpack.c.bf16 %v89_v16, %v88_v15 }
  0xeb   :  { %3970 = vmatpush3.bf16.msra.mxu0 %v3969_v19 }
  0xec   :  { %3796 = vmatprep.subr.mxu0 %v4262_v3 }
  0xee   :  { %3794 = vmatmul.mubr.msk.f32.vlgmr.msra.gmra.mrb[2].mxu0 %vm97_vm2, %v4438_v20 }
  0xef   :  { %3798 = vmatprep.mubr.msk.f32.mxu0 %vm4261_vm0, %v4262_v3 }
 0x156   :  { %v174_v21 = vpop.permute.xlu0 %173  ;;  %v182_v24 = vpop.permute.xlu1 %181 }
 0x157   :  { %v185_v22 = vsel %vm184_vm3, %v167_v12, %v174_v21  ;;  %v86_v12 = vld [vmem:[%s5188_s8] sm:$0xff]  ;;  %v703_v21 = vlaneseq }
 0x158   :  { %v4511_v14 = vpack.c.bf16 %v87_v13, %v86_v12 }
 0x15a   :  { %v178_v23 = vpop.permute.xlu0 %177 }
 0x15b   :  { %v187_v25 = vsel %vm186_vm4, %v185_v22, %v178_v23  ;;  %v4530_v22 = vshrl.u32 %v703_v21, 7 }
 0x15c   :  { %v189_v26 = vsel %vm188_vm5, %v187_v25, %v182_v24 }
 0x15d   :  { %345 = vxpose.xlu1.b32.start.end [1/1] (short) (narrow) %v189_v26, 8  ;;  %v4533_v23 = vsub.s32 0, %v4530_v22 }
 0x1c1   :  { %v341_v27 = vpop.f32.mrb[2].mxu0 }
 0x1c2   :  { %v3795_v28 = vpop.f32.mrb[3].mxu0  ;;  %3797 = vmatpush3.msk.msra.mxu0 %vm381_vm6, %v341_v27 }
 0x1c3   :  { %3806 = vmatprep.subr.mxu0 %v4262_v3 }
 0x1dd   :  { %v361_v29 = vpop.trf.xlu1 }
 0x1de   :  { %3799 = vmatmul.mubr.msk.f32.vlgmr.msra.gmra.mrb[4].mxu0 %vm377_vm7, %v361_v29 }
 0x1df   :  { %3808 = vmatprep.mubr.msk.f32.mxu0 %vm4261_vm0, %v4262_v3 }
 0x2b1   :  { %v451_v31 = vpop.f32.mrb[4].mxu0 }
 0x2b2   :  { %v452_v32 = vadd.f32 %v451_v31, %v4456_v30  ;;  %v3800_v33 = vpop.f32.mrb[5].mxu0 }
 0x2b4   :  { %v3444_v34 = vmul.f32 -1.442695, %v452_v32 }
 0x2b6   :  { %4200 = vpow2.f32 %v3444_v34 }
 0x2c0   :  { %v4201_v35 = vpop.eup %4200 }
 0x2c1   :  { %v458_v36 = vadd.f32 1.0, %v4201_v35 }
 0x2c3   :  { %4202 = vrcp.f32 %v458_v36  ;;  %v4560_v36 = vld [vmem:[%s5189_s10] sm:$0xff] }
 0x2cd   :  { %v4203_v38 = vpop.eup %4202 }
 0x2ce   :  { %3802 = vmatpush3.msra.mxu1 %v4203_v38  ;;  %v4567_v38 = vld [vmem:[%s5209_s26 + $0x10] sm:$0xff] }
 0x2cf   :  { %3804 = vmatmul.mubr.msk.f32.vlgmr.msra.gmra.mrb[2].mxu1 %vm461_vm8, %v4462_v37  ;;  %3811 = vmatprep.subr.mxu1 %v4262_v3 }
 0x2d0   :  { %3813 = vmatprep.mubr.msk.f32.mxu1 %vm4261_vm0, %v4262_v3  ;;  %3812 = vmatpush3.msra.mxu1 %v4472_v39 }
 0x2d1   :  { %3980 = vmatprep.subr.bf16.mxu1 %v4511_v14 }
 0x3a2   :  { %v531_v40 = vpop.f32.mrb[2].mxu1 }
 0x3a3   :  { %v535_v41 = vsel %vm461_vm8, %v531_v40, -inf  ;;  %v3805_v42 = vpop.f32.mrb[3].mxu1 }
 0x3a4   :  { %v536_v43 = vrot.slane %v535_v41, 4  ;;  %v4587_v42 = vld [vmem:[%s5190_s9 + $0x8] sm:$0xff] }
 0x3a6   :  { %v537_v44 = vmax.f32 %v535_v41, %v536_v43  ;;  %v4592_v43 = vld [vmem:[%s5190_s9] sm:$0xff] }
 0x3a8   :  { %v538_v45 = vrot.slane %v537_v44, 2 }
 0x3aa   :  { %v539_v46 = vmax.f32 %v537_v44, %v538_v45 }
 0x3ac   :  { %v540_v47 = vrot.slane %v539_v46, 1 }
 0x3ae   :  { %v541_v48 = vmax.f32 %v539_v46, %v540_v47 }
 0x3b0   :  { %v542_v49 = vsub.f32 %v531_v40, %v541_v48  ;;  %v4572_v40 = vld [vmem:[%s5209_s26 + $0x18] sm:$0xff] }
 0x3b1   :  { %v4576_v41 = vpack.c.bf16 %v4572_v40, %v4567_v38 }
 0x3b2   :  { %v543_v50 = vmul.f32 1.442695, %v542_v49 }
 0x3b4   :  { %4204 = vpow2.f32 %v543_v50 }
 0x3be   :  { %v4205_v51 = vpop.eup %4204 }
 0x3bf   :  { %v545_v52 = vsel %vm461_vm8, %v4205_v51, 0.0 }
 0x3c0   :  { %v546_v53 = vrot.slane %v545_v52, 4 }
 0x3c2   :  { %v547_v54 = vadd.f32 %v546_v53, %v545_v52 }
 0x3c4   :  { %v548_v55 = vrot.slane %v547_v54, 2 }
 0x3c6   :  { %v549_v56 = vadd.f32 %v548_v55, %v547_v54  ;;  %v4599_v55 = vld [vmem:[%s5189_s10 + $0x8] sm:$0xff] }
 0x3c8   :  { %v550_v57 = vrot.slane %v549_v56, 1 }
 0x3ca   :  { %v551_v58 = vadd.f32 %v550_v57, %v549_v56 }
 0x3cc   :  { %4206 = vrcp.f32 %v551_v58 }
 0x3d6   :  { %v4207_v61 = vpop.eup %4206 }
 0x3d7   :  { %v553_v63 = vmul.f32 %v4207_v61, %v4205_v51 }
 0x3d9   :  { %3807 = vmatpush3.xpose.msk.msra.mxu0 %vm461_vm8, %v553_v63 }
 0x3da   :  { %3972 = vmatprep.subr.bf16.mxu0 %v4483_v62 }
 0x3dc   :  { %3809 = vmatmul.mubr.msk.f32.vlgmr.msra.gmra.mrb[6].mxu0 %vm461_vm8, %v4495_v7 }
 0x3dd   :  { %3974 = vmatpush3.bf16.msra.mxu0 %v4483_v62 }
 0x3de   :  { %3976 = vmatprep.subr.bf16.mxu0 %v4498_v9 }
 0x3e1   :  { %3978 = vmatpush3.bf16.msra.mxu0 %v4498_v9 }
 0x3e2   :  { %3838 = vmatprep.subr.mxu0 %v553_v63 }
 0x4af   :  { %v626_v18 = vpop.f32.mrb[6].mxu0 }
 0x4b0   :  { %v3810_v19 = vpop.f32.mrb[7].mxu0  ;;  %3814 = vmatmul.mubr.msk.f32.vlgmr.msra.gmra.mrb[4].mxu1 %vm461_vm8, %v626_v18 }
 0x4b1   :  { %3982 = vmatpush3.bf16.msra.mxu1 %v4511_v14  ;;  %3835 = vmatprep.mubr.msk.f32.mxu1 %vm190_vm1, %v4381_v1 }
 0x4b2   :  { %3984 = vmatprep.subr.bf16.mxu1 %v4520_v17 }
 0x4b5   :  { %3986 = vmatpush3.bf16.msra.mxu1 %v4520_v17 }
 0x4b8   :  { %3836 = vmatmul.mubr.msk.f32.vlgmr.msra.gmra.mrb[6].mxu1 %vm190_vm1, %v4386_v2 }
 0x583   :  { %v699_v24 = vpop.f32.mrb[4].mxu1 }
 0x584   :  { %v706_v25 = vrot.slane %v699_v24, %v4533_v23  ;;  %v3815_v26 = vpop.f32.mrb[5].mxu1 }
 0x586   :  { %v707_v27 = vmul.f32 %v706_v25, %v4381_v1  ;;  %v708_v28 = vmul.f32 %v706_v25, %v4386_v2 }
 0x588   :  { %3824 = vmatprep.mubr.msk.f32.mxu0 %vm190_vm1, %v707_v27 }
 0x589   :  { %3825 = vmatmul.mubr.msk.f32.vlgmr.msra.gmra.mrb[8].mxu0 %vm190_vm1, %v708_v28 }
 0x58a   :  { %3839 = vmatpush3.msra.mxu0 %v553_v63 }
 0x58b   :  { %v3837_v29 = vpop.f32.mrb[6].mxu1 }
 0x58c   :  { %v856_v31 = vpop.f32.mrb[7].mxu1 }
 0x58d   :  { %3840 = vmatprep.mubr.msk.f32.mxu0 %vm461_vm8, %v856_v31 }
 0x58e   :  { %3841 = vmatmul.mubr.msk.f32.vlgmr.msra.gmra.mrb[10].mxu0 %vm461_vm8, %v3837_v29 }
 0x58f   :  { %3854 = vmatprep.mubr.msk.f32.mxu0 %vm97_vm2, %v4560_v36 }
 0x65c   :  { %v3826_v32 = vpop.f32.mrb[8].mxu0 }
 0x65d   :  { %v781_v33 = vpop.f32.mrb[9].mxu0 }
 0x65e   :  { %3847 = vmatprep.mubr.msk.f32.mxu1 %vm461_vm8, %v781_v33 }
 0x661   :  { %v3842_v34 = vpop.f32.mrb[10].mxu0 }
 0x662   :  { %v937_v35 = vpop.f32.mrb[11].mxu0 }
 0x663   :  { %v3987_v2 = vpack.c.bf16 %v3842_v34, %v937_v35 }
 0x665   :  { %3989 = vmatprep.subr.msk.bf16.mxu1 %vm4545_vm9, %v3987_v2 }
 0x666   :  { %3992 = vmatpush3.bf16.xpose.msk.msra.mxu1 %vm4545_vm9, %v3987_v2 }
 0x667   :  { %4001 = vmatprep.subr.bf16.mxu1 %v4260_v0 }
 0x66d   :  { %3848 = vmatmul.mubr.msk.f32.vlgmr.msra.gmra.mrb[8].mxu1 %vm461_vm8, %v3826_v32 }
 0x66e   :  { %3868 = vmatprep.mubr.msk.f32.mxu1 %vm4261_vm0, %v4262_v3  ;;  %4003 = vmatpush3.bf16.msra.mxu1 %v4576_v41 }
 0x66f   :  { %4012 = vmatprep.subr.bf16.mxu1 %v4260_v0 }
 0x671   :  { %3869 = vmatmul.mubr.msk.f32.vlgmr.msra.gmra.mrb[10].mxu1 %vm97_vm2, %v4414_v10 }
 0x672   :  { %3886 = vmatprep.mubr.msk.f32.mxu1 %vm4261_vm0, %v4262_v3 }
 0x740   :  { %v3849_v44 = vpop.f32.mrb[8].mxu1 }
 0x741   :  { %v1030_v45 = vadd.f32 %v3849_v44, %v4587_v42  ;;  %v1024_v0 = vpop.f32.mrb[9].mxu1 }
 0x742   :  { %v1025_v46 = vadd.f32 %v1024_v0, %v4592_v43 }
 0x743   :  { %v3460_v10 = vmul.f32 -1.442695, %v1030_v45 }
 0x744   :  { %v3459_v47 = vmul.f32 -1.442695, %v1025_v46  ;;  %v1302_v56 = vpop.f32.mrb[10].mxu1 }
 0x745   :  { %4208 = vpow2.f32 %v3460_v10  ;;  %v1307_v57 = vrot.slane %v1302_v56, 7  ;;  %v3870_v58 = vpop.f32.mrb[11].mxu1  ;;  %v1311_v59 = vrot.slane %v1302_v56, 6  ;;  %v1315_v60 = vrot.slane %v1302_v56, 5  ;;  %v4616_v10 = vld [vmem:[%s5191_s11] sm:$0xff] }
 0x746   :  { %4210 = vpow2.f32 %v3459_v47  ;;  %v4621_v47 = vld [vmem:[%s5191_s11 + $0x8] sm:$0xff] }
 0x747   :  { %1308 = vrot.lane.b32.xlu0 %v1307_v57, %s4264_s2 }
 0x74b   :  { %1312 = vrot.lane.b32.xlu0 %v1311_v59, %s4265_s28 }
 0x74f   :  { %v4209_v48 = vpop.eup %4208  ;;  %1316 = vrot.lane.b32.xlu0 %v1315_v60, %s4263_s27 }
 0x750   :  { %v4211_v49 = vpop.eup %4210  ;;  %v1040_v50 = vadd.f32 1.0, %v4209_v48 }
 0x751   :  { %v1039_v51 = vadd.f32 1.0, %v4211_v49 }
 0x752   :  { %4212 = vrcp.f32 %v1040_v50 }
 0x753   :  { %4214 = vrcp.f32 %v1039_v51 }
 0x75c   :  { %v4213_v52 = vpop.eup %4212 }
 0x75d   :  { %v4215_v53 = vpop.eup %4214 }
 0x75e   :  { %v3993_v54 = vpack.c.bf16 %v4213_v52, %v4215_v53 }
 0x760   :  { %3994 = vmatprep.subr.bf16.mxu0 %v3993_v54 }
 0x761   :  { %3996 = vmatpush3.bf16.msra.mxu0 %v3993_v54 }
 0x762   :  { %3998 = vmatprep.subr.bf16.mxu0 %v4392_v4 }
 0x764   :  { %3855 = vmatmul.mubr.msk.f32.vlgmr.msra.gmra.mrb[12].mxu0 %vm97_vm2, %v4599_v55 }
 0x765   :  { %4000 = vmatpush3.bf16.msra.mxu0 %v4392_v4 }
 0x766   :  { %4005 = vmatprep.subr.bf16.mxu0 %v4405_v8 }
 0x7b9   :  { %v1309_v52 = vpop.permute.xlu0 %1308 }
 0x7ba   :  { %v1319_v53 = vsel %vm184_vm3, %v1302_v56, %v1309_v52 }
 0x7bd   :  { %v1313_v54 = vpop.permute.xlu0 %1312 }
 0x7be   :  { %v1320_v57 = vsel %vm186_vm4, %v1319_v53, %v1313_v54 }
 0x7c1   :  { %v1317_v58 = vpop.permute.xlu0 %1316 }
 0x7c2   :  { %v1321_v59 = vsel %vm188_vm5, %v1320_v57, %v1317_v58 }
 0x7c3   :  { %1473 = vxpose.xlu0.b32.start.end [1/1] (short) (narrow) %v1321_v59, 8  ;;  %v4126_v59 = vld [vmem:[%s5192_s13 + $0x4] ss:$8 sps:$4 sm:$0xff]  }
 0x837   :  { %v3856_v61 = vpop.f32.mrb[12].mxu0 }
 0x838   :  { %v1127_v63 = vsel %vm97_vm2, %v3856_v61, -inf  ;;  %v1117_v5 = vpop.f32.mrb[13].mxu0 }
 0x839   :  { %v1126_v6 = vsel %vm97_vm2, %v1117_v5, -inf }
 0x83a   :  { %v1128_v12 = vmax.f32 %v1126_v6, %v1127_v63 }
 0x83c   :  { %v1129_v13 = vrot.slane %v1128_v12, 4 }
 0x83e   :  { %v1130_v15 = vmax.f32 %v1128_v12, %v1129_v13 }
 0x840   :  { %v1131_v16 = vrot.slane %v1130_v15, 2 }
 0x842   :  { %v1132_v18 = vmax.f32 %v1130_v15, %v1131_v16 }
 0x844   :  { %v1133_v19 = vrot.slane %v1132_v18, 1 }
 0x846   :  { %v1134_v21 = vmax.f32 %v1132_v18, %v1133_v19 }
 0x848   :  { %v1135_v24 = vsub.f32 %v1117_v5, %v1134_v21  ;;  %v1136_v25 = vsub.f32 %v3856_v61, %v1134_v21  ;;  %v1489_v5 = vpop.trf.xlu0 }
 0x84a   :  { %v1137_v26 = vmul.f32 1.442695, %v1135_v24  ;;  %v1139_v27 = vmul.f32 1.442695, %v1136_v25 }
 0x84c   :  { %4216 = vpow2.f32 %v1137_v26 }
 0x84d   :  { %4218 = vpow2.f32 %v1139_v27 }
 0x856   :  { %v4217_v28 = vpop.eup %4216 }
 0x857   :  { %v4219_v29 = vpop.eup %4218  ;;  %v1141_v31 = vsel %vm97_vm2, %v4217_v28, 0.0 }
 0x858   :  { %v1142_v32 = vsel %vm97_vm2, %v4219_v29, 0.0 }
 0x859   :  { %v1143_v33 = vadd.f32 %v1142_v32, %v1141_v31 }
 0x85b   :  { %v1144_v34 = vrot.slane %v1143_v33, 4 }
 0x85d   :  { %v1145_v35 = vadd.f32 %v1144_v34, %v1143_v33 }
 0x85f   :  { %v1146_v2 = vrot.slane %v1145_v35, 2 }
 0x861   :  { %v1147_v44 = vadd.f32 %v1146_v2, %v1145_v35 }
 0x863   :  { %v1148_v45 = vrot.slane %v1147_v44, 1 }
 0x865   :  { %v1149_v0 = vadd.f32 %v1148_v45, %v1147_v44 }
 0x867   :  { %4220 = vrcp.f32 %v1149_v0 }
 0x871   :  { %v4221_v46 = vpop.eup %4220 }
 0x872   :  { %v1151_v48 = vmul.f32 %v4221_v46, %v4217_v28  ;;  %v1152_v49 = vmul.f32 %v4221_v46, %v4219_v29 }
 0x874   :  { %v1153_v50 = vmul.f32 %v1151_v48, %v4616_v10  ;;  %v1154_v51 = vmul.f32 %v1152_v49, %v4621_v47 }
 0x876   :  { %3861 = vmatprep.mubr.msk.f32.mxu0 %vm97_vm2, %v1153_v50 }
 0x877   :  { %3862 = vmatmul.mubr.msk.f32.vlgmr.msra.gmra.mrb[14].mxu0 %vm97_vm2, %v1154_v51 }
 0x878   :  { %4007 = vmatpush3.bf16.msra.mxu0 %v4405_v8  ;;  %3879 = vmatprep.mubr.msk.f32.mxu0 %vm190_vm1, %v4567_v38 }
 0x879   :  { %4009 = vmatprep.subr.bf16.mxu0 %v4416_v11 }
 0x87c   :  { %4011 = vmatpush3.bf16.msra.mxu0 %v4416_v11 }
 0x87d   :  { %3894 = vmatprep.subr.mxu0 %v4262_v3 }
 0x87f   :  { %3880 = vmatmul.mubr.msk.f32.vlgmr.msra.gmra.mrb[16].mxu0 %vm190_vm1, %v4572_v40 }
 0x880   :  { %3896 = vmatprep.mubr.msk.f32.mxu0 %vm4261_vm0, %v4262_v3 }
 0x94a   :  { %v4640_v8 = vpop.f32.mrb[14].mxu0 }
 0x94b   :  { %v4642_v56 = vpop.f32.mrb[15].mxu0 }
 0x94c   :  { %v2349_v60 = vpack.c.bf16 %v4640_v8, %v4642_v56 }
 0x952   :  { %v3881_v11 = vpop.f32.mrb[16].mxu0 }
 0x953   :  { %v1394_v61 = vpop.f32.mrb[17].mxu0 }
 0x954   :  { %v4013_v63 = vpack.c.bf16 %v3881_v11, %v1394_v61  ;;  %v4129_v11 = vld [vmem:[%s5192_s13 + $0x14] ss:$8 sps:$4 sm:$0xff]   ;;  %v4127_v61 = vld [vmem:[%s5192_s13 + $0x10] ss:$8 sps:$4 sm:$0xff]  }
 0x956   :  { %4014 = vmatpush3.bf16.msra.mxu1 %v4013_v63  ;;  %v4266_v63 = vmov 0  }
 0x957   :  { %3889 = vmatprep.subr.mxu1 %v4262_v3 }
 0x959   :  { %3887 = vmatmul.mubr.msk.f32.vlgmr.msra.gmra.mrb[12].mxu1 %vm97_vm2, %v4438_v20 }
 0x95a   :  { %3891 = vmatprep.mubr.msk.f32.mxu1 %vm4261_vm0, %v4262_v3 }
 0xa2c   :  { %v1469_v6 = vpop.f32.mrb[12].mxu1 }
 0xa2d   :  { %v3888_v12 = vpop.f32.mrb[13].mxu1  ;;  %3890 = vmatpush3.msk.msra.mxu1 %vm381_vm6, %v1469_v6 }
 0xa2e   :  { %3892 = vmatmul.mubr.msk.f32.vlgmr.msra.gmra.mrb[14].mxu1 %vm377_vm7, %v1489_v5  ;;  %3899 = vmatprep.subr.mxu1 %v4262_v3 }
 0xa2f   :  { %3901 = vmatprep.mubr.msk.f32.mxu1 %vm4261_vm0, %v4262_v3 }
 0xb01   :  { %v1577_v13 = vpop.f32.mrb[14].mxu1 }
 0xb02   :  { %v1578_v15 = vadd.f32 %v1577_v13, %v4456_v30  ;;  %v3893_v16 = vpop.f32.mrb[15].mxu1 }
 0xb04   :  { %v3471_v20 = vmul.f32 -1.442695, %v1578_v15 }
 0xb06   :  { %4222 = vpow2.f32 %v3471_v20 }
 0xb10   :  { %v4223_v18 = vpop.eup %4222 }
 0xb11   :  { %v1584_v19 = vadd.f32 1.0, %v4223_v18 }
 0xb13   :  { %4224 = vrcp.f32 %v1584_v19 }
 0xb1d   :  { %v4225_v21 = vpop.eup %4224 }
 0xb1e   :  { %3895 = vmatpush3.msra.mxu0 %v4225_v21 }
 0xb1f   :  { %3897 = vmatmul.mubr.msk.f32.vlgmr.msra.gmra.mrb[18].mxu0 %vm461_vm8, %v4462_v37  ;;  %3904 = vmatprep.subr.mxu0 %v4262_v3 }
 0xb20   :  { %3905 = vmatpush3.msra.mxu0 %v4472_v39  ;;  %3906 = vmatprep.mubr.msk.f32.mxu0 %vm4261_vm0, %v4262_v3 }
 0xb21   :  { %4024 = vmatprep.subr.bf16.mxu0 %v4511_v14 }
 0xbf2   :  { %v1653_v30 = vpop.f32.mrb[18].mxu0 }
 0xbf3   :  { %v1657_v24 = vsel %vm461_vm8, %v1653_v30, -inf  ;;  %v3898_v25 = vpop.f32.mrb[19].mxu0 }
 0xbf4   :  { %v1658_v26 = vrot.slane %v1657_v24, 4 }
 0xbf6   :  { %v1659_v27 = vmax.f32 %v1657_v24, %v1658_v26 }
 0xbf8   :  { %v1660_v28 = vrot.slane %v1659_v27, 2 }
 0xbfa   :  { %v1661_v29 = vmax.f32 %v1659_v27, %v1660_v28 }
 0xbfc   :  { %v1662_v31 = vrot.slane %v1661_v29, 1 }
 0xbfe   :  { %v1663_v32 = vmax.f32 %v1661_v29, %v1662_v31  ;;  %v4132_v31 = vld [vmem:[%s5193_s15 + $0x4] ss:$8 sps:$4 sm:$0xff]  }
 0xc00   :  { %v1664_v37 = vsub.f32 %v1653_v30, %v1663_v32 }
 0xc02   :  { %v1665_v33 = vmul.f32 1.442695, %v1664_v37 }
 0xc04   :  { %4226 = vpow2.f32 %v1665_v33 }
 0xc0e   :  { %v4227_v34 = vpop.eup %4226 }
 0xc0f   :  { %v1667_v39 = vsel %vm461_vm8, %v4227_v34, 0.0 }
 0xc10   :  { %v1668_v35 = vrot.slane %v1667_v39, 4 }
 0xc12   :  { %v1669_v2 = vadd.f32 %v1668_v35, %v1667_v39 }
 0xc14   :  { %v1670_v44 = vrot.slane %v1669_v2, 2 }
 0xc16   :  { %v1671_v45 = vadd.f32 %v1670_v44, %v1669_v2 }
 0xc18   :  { %v1672_v0 = vrot.slane %v1671_v45, 1 }
 0xc1a   :  { %v1673_v46 = vadd.f32 %v1672_v0, %v1671_v45 }
 0xc1c   :  { %4228 = vrcp.f32 %v1673_v46 }
 0xc26   :  { %v4229_v48 = vpop.eup %4228 }
 0xc27   :  { %v1675_v49 = vmul.f32 %v4229_v48, %v4227_v34 }
 0xc29   :  { %3900 = vmatpush3.xpose.msk.msra.mxu1 %vm461_vm8, %v1675_v49 }
 0xc2a   :  { %4016 = vmatprep.subr.bf16.mxu1 %v4483_v62 }
 0xc2c   :  { %3902 = vmatmul.mubr.msk.f32.vlgmr.msra.gmra.mrb[16].mxu1 %vm461_vm8, %v4495_v7 }
 0xc2d   :  { %4018 = vmatpush3.bf16.msra.mxu1 %v4483_v62 }
 0xc2e   :  { %4020 = vmatprep.subr.bf16.mxu1 %v4498_v9 }
 0xc31   :  { %4022 = vmatpush3.bf16.msra.mxu1 %v4498_v9 }
 0xc32   :  { %3931 = vmatprep.subr.mxu1 %v1675_v49 }
 0xcff   :  { %v1745_v50 = vpop.f32.mrb[16].mxu1 }
 0xd00   :  { %3907 = vmatmul.mubr.msk.f32.vlgmr.msra.gmra.mrb[20].mxu0 %vm461_vm8, %v1745_v50  ;;  %v3903_v51 = vpop.f32.mrb[17].mxu1 }
 0xd01   :  { %4026 = vmatpush3.bf16.msra.mxu0 %v4511_v14  ;;  %3928 = vmatprep.mubr.msk.f32.mxu0 %vm190_vm1, %v4567_v38 }
 0xd02   :  { %4028 = vmatprep.subr.bf16.mxu0 %v4520_v17 }
 0xd05   :  { %4030 = vmatpush3.bf16.msra.mxu0 %v4520_v17 }
 0xd08   :  { %3929 = vmatmul.mubr.msk.f32.vlgmr.msra.gmra.mrb[22].mxu0 %vm190_vm1, %v4572_v40 }
 0xdd3   :  { %v1818_v62 = vpop.f32.mrb[20].mxu0 }
 0xdd4   :  { %v1825_v7 = vrot.slane %v1818_v62, %v4533_v23  ;;  %v3908_v9 = vpop.f32.mrb[21].mxu0 }
 0xdd6   :  { %v1826_v52 = vmul.f32 %v1825_v7, %v4567_v38  ;;  %v1827_v53 = vmul.f32 %v1825_v7, %v4572_v40 }
 0xdd8   :  { %3917 = vmatprep.mubr.msk.f32.mxu1 %vm190_vm1, %v1826_v52 }
 0xdd9   :  { %3918 = vmatmul.mubr.msk.f32.vlgmr.msra.gmra.mrb[18].mxu1 %vm190_vm1, %v1827_v53 }
 0xdda   :  { %3932 = vmatpush3.msra.mxu1 %v1675_v49 }
 0xddb   :  { %v3930_v14 = vpop.f32.mrb[22].mxu0 }
 0xddc   :  { %v1975_v54 = vpop.f32.mrb[23].mxu0 }
 0xddd   :  { %3933 = vmatprep.mubr.msk.f32.mxu1 %vm461_vm8, %v1975_v54 }
 0xdde   :  { %3934 = vmatmul.mubr.msk.f32.vlgmr.msra.gmra.mrb[20].mxu1 %vm461_vm8, %v3930_v14 }
 0xddf   :  { %3947 = vmatprep.mubr.msk.f32.mxu1 %vm97_vm2, %v4560_v36  ;;  %v4124_v36 = vld [vmem:[%s5192_s13] ss:$8 sps:$4 sm:$0xff]  }
 0xeac   :  { %v3919_v17 = vpop.f32.mrb[18].mxu1 }
 0xead   :  { %v1900_v57 = vpop.f32.mrb[19].mxu1 }
 0xeae   :  { %3940 = vmatprep.mubr.msk.f32.mxu0 %vm461_vm8, %v1900_v57 }
 0xeb1   :  { %v3935_v38 = vpop.f32.mrb[20].mxu1 }
 0xeb2   :  { %v2056_v40 = vpop.f32.mrb[21].mxu1 }
 0xeb3   :  { %v4031_v58 = vpack.c.bf16 %v3935_v38, %v2056_v40 }
 0xeb5   :  { %4033 = vmatprep.subr.msk.bf16.mxu0 %vm4545_vm9, %v4031_v58 }
 0xeb6   :  { %4036 = vmatpush3.bf16.xpose.msk.msra.mxu0 %vm4545_vm9, %v4031_v58 }
 0xeb7   :  { %2381 = vmatprep.subr.bf16.mxu0 %v4126_v59 }
 0xebd   :  { %3941 = vmatmul.mubr.msk.f32.vlgmr.msra.gmra.mrb[24].mxu0 %vm461_vm8, %v3919_v17 }
 0xebe   :  { %2382 = vmatpush1.bf16.msra.mxu0 %v4124_v36  ;;  %2413 = vmatprep.mubr.bf16.mxu0 %v4266_v63 }
 0xebf   :  { %2383 = vmatprep.subr.bf16.mxu0 %v4129_v11  ;;  %v4130_v11 = vld [vmem:[%s5193_s15] ss:$8 sps:$4 sm:$0xff]  }
 0xec2   :  { %2384 = vmatpush1.bf16.msra.mxu0 %v4127_v61 }
 0xec5   :  { %3496 = vmatmul.mubr.msk.bf16.vlgmr.msra.gmra.mrb[28].mxu0 %vm190_vm1, %v2349_v60 }
 0xec6   :  { %2423 = vmatprep.mubr.bf16.mxu0 %v4266_v63 }
 0xf90   :  { %v3942_v1 = vpop.f32.mrb[24].mxu0 }
 0xf91   :  { %v2149_v5 = vadd.f32 %v3942_v1, %v4587_v42  ;;  %v2143_v6 = vpop.f32.mrb[25].mxu0  ;;  %v4135_v1 = vld [vmem:[%s5193_s15 + $0x14] ss:$8 sps:$4 sm:$0xff]  }
 0xf92   :  { %v2144_v12 = vadd.f32 %v2143_v6, %v4592_v43  ;;  %v4141_v6 = vld [vmem:[%s5194_s14 + $0x14] ss:$8 sps:$4 sm:$0xff]  }
 0xf93   :  { %v3487_v13 = vmul.f32 -1.442695, %v2149_v5  ;;  %v4133_v5 = vld [vmem:[%s5193_s15 + $0x10] ss:$8 sps:$4 sm:$0xff]  }
 0xf94   :  { %v3486_v15 = vmul.f32 -1.442695, %v2144_v12  ;;  %v4139_v12 = vld [vmem:[%s5194_s14 + $0x10] ss:$8 sps:$4 sm:$0xff]  }
 0xf95   :  { %4230 = vpow2.f32 %v3487_v13  ;;  %v4144_v13 = vld [vmem:[%s5194_s14 + $0x24] ss:$8 sps:$4 sm:$0xff]  }
 0xf96   :  { %4232 = vpow2.f32 %v3486_v15  ;;  %v4142_v15 = vld [vmem:[%s5194_s14 + $0x20] ss:$8 sps:$4 sm:$0xff]  }
 0xf98   :  { %v2415_v16 = vpop.f32.mrb[28].mxu0 }
 0xf99   :  { %v2417_v20 = vpop.f32.mrb[29].mxu0  ;;  %v2434_v19 = vmax.f32 %v2415_v16, 0.0  ;;  %v4150_v16 = vld [vmem:[%s5194_s14 + $0x44] ss:$8 sps:$4 sm:$0xff]  }
 0xf9a   :  { %v2419_v18 = vpop.f32.mrb[30].mxu0  ;;  %v2435_v56 = vmax.f32 %v2417_v20, 0.0  ;;  %v4148_v20 = vld [vmem:[%s5194_s14 + $0x40] ss:$8 sps:$4 sm:$0xff]  }
 0xf9b   :  { %v2436_v21 = vmax.f32 %v2419_v18, 0.0  ;;  %v2421_v8 = vpop.f32.mrb[31].mxu0  ;;  %v4151_v18 = vld [vmem:[%s5194_s14 + $0x50] ss:$8 sps:$4 sm:$0xff]  }
 0xf9c   :  { %v2437_v60 = vmax.f32 %v2421_v8, 0.0  ;;  %v4159_v8 = vld [vmem:[%s5194_s14 + $0x74] ss:$8 sps:$4 sm:$0xff]  }
 0xf9d   :  { %v4716_v30 = vpack.c.bf16 %v2436_v21, %v2434_v19  ;;  %v4156_v19 = vld [vmem:[%s5194_s14 + $0x64] ss:$8 sps:$4 sm:$0xff]   ;;  %v4154_v21 = vld [vmem:[%s5194_s14 + $0x60] ss:$8 sps:$4 sm:$0xff]  }
 0xf9e   :  { %v4718_v24 = vpack.c.bf16 %v2437_v60, %v2435_v56  ;;  %v4157_v56 = vld [vmem:[%s5194_s14 + $0x70] ss:$8 sps:$4 sm:$0xff]   ;;  %v4162_v60 = vld [vmem:[%s5194_s14 + $0x84] ss:$8 sps:$4 sm:$0xff]  }
 0xf9f   :  { %v4231_v42 = vpop.eup %4230 }
 0xfa0   :  { %v4233_v25 = vpop.eup %4232  ;;  %v2159_v26 = vadd.f32 1.0, %v4231_v42  ;;  %v4165_v42 = vld [vmem:[%s5194_s14 + $0x94] ss:$8 sps:$4 sm:$0xff]  }
 0xfa1   :  { %v2158_v43 = vadd.f32 1.0, %v4233_v25  ;;  %v4163_v25 = vld [vmem:[%s5194_s14 + $0x90] ss:$8 sps:$4 sm:$0xff]  }
 0xfa2   :  { %4234 = vrcp.f32 %v2159_v26  ;;  %v4168_v26 = vld [vmem:[%s5194_s14 + $0xa4] ss:$8 sps:$4 sm:$0xff]  }
 0xfa3   :  { %4236 = vrcp.f32 %v2158_v43  ;;  %v4166_v43 = vld [vmem:[%s5194_s14 + $0xa0] ss:$8 sps:$4 sm:$0xff]  }
 0xfac   :  { %v4235_v27 = vpop.eup %4234 }
 0xfad   :  { %v4237_v28 = vpop.eup %4236 }
 0xfae   :  { %v4037_v29 = vpack.c.bf16 %v4235_v27, %v4237_v28  ;;  %v4171_v27 = vld [vmem:[%s5194_s14 + $0xb4] ss:$8 sps:$4 sm:$0xff]   ;;  %v4169_v28 = vld [vmem:[%s5194_s14 + $0xb0] ss:$8 sps:$4 sm:$0xff]  }
 0xfb0   :  { %4038 = vmatprep.subr.bf16.mxu1 %v4037_v29 }
 0xfb1   :  { %4040 = vmatpush3.bf16.msra.mxu1 %v4037_v29  ;;  %v4174_v29 = vld [vmem:[%s5194_s14 + $0xc4] ss:$8 sps:$4 sm:$0xff]  }
 0xfb2   :  { %4042 = vmatprep.subr.bf16.mxu1 %v4576_v41 }
 0xfb4   :  { %3948 = vmatmul.mubr.msk.f32.vlgmr.msra.gmra.mrb[22].mxu1 %vm97_vm2, %v4599_v55 }
 0xfb5   :  { %4044 = vmatpush3.bf16.msra.mxu1 %v4576_v41 }
 0xfb6   :  { %2510 = vmatprep.subr.bf16.mxu1 %v4132_v31  ;;  %v4172_v31 = vld [vmem:[%s5194_s14 + $0xc0] ss:$8 sps:$4 sm:$0xff]  }
0x1087   :  { %v3949_v32 = vpop.f32.mrb[22].mxu1 }
0x1088   :  { %v2240_v37 = vsel %vm97_vm2, %v3949_v32, -inf  ;;  %v2230_v33 = vpop.f32.mrb[23].mxu1 }
0x1089   :  { %v2239_v34 = vsel %vm97_vm2, %v2230_v33, -inf }
0x108a   :  { %v2241_v39 = vmax.f32 %v2239_v34, %v2240_v37  ;;  %v4175_v37 = vld [vmem:[%s5194_s14 + $0xd0] ss:$8 sps:$4 sm:$0xff]   ;;  %v4178_v34 = vld [vmem:[%s5194_s14 + $0xe0] ss:$8 sps:$4 sm:$0xff]  }
0x108c   :  { %v2242_v35 = vrot.slane %v2241_v39, 4 }
0x108e   :  { %v2243_v2 = vmax.f32 %v2241_v39, %v2242_v35  ;;  %v4183_v39 = vld [vmem:[%s5194_s14 + $0xf4] ss:$8 sps:$4 sm:$0xff]   ;;  %v4181_v35 = vld [vmem:[%s5194_s14 + $0xf0] ss:$8 sps:$4 sm:$0xff]  }
0x1090   :  { %v2244_v44 = vrot.slane %v2243_v2, 2 }
0x1092   :  { %v2245_v45 = vmax.f32 %v2243_v2, %v2244_v44  ;;  %v2820_v2 = vld [vmem:[%s5195_s17 + $0x80] sm:$0xff]  ;;  %v2821_v44 = vld [vmem:[%s5195_s17 + $0x88] sm:$0xff] }
0x1094   :  { %v2246_v0 = vrot.slane %v2245_v45, 1 }
0x1096   :  { %v2247_v55 = vmax.f32 %v2245_v45, %v2246_v0  ;;  %v2804_v45 = vld [vmem:[%s5195_s17] sm:$0xff]  ;;  %v4045_v0 = vpack.c.bf16 %v2821_v44, %v2820_v2 }
0x1098   :  { %v2248_v46 = vsub.f32 %v2230_v33, %v2247_v55  ;;  %v2249_v48 = vsub.f32 %v3949_v32, %v2247_v55  ;;  %v4177_v32 = vld [vmem:[%s5194_s14 + $0xd4] ss:$8 sps:$4 sm:$0xff]   ;;  %v4180_v33 = vld [vmem:[%s5194_s14 + $0xe4] ss:$8 sps:$4 sm:$0xff]   ;;  %4046 = vmatprep.subr.bf16.mxu0 %v4045_v0 }
0x1099   :  { %v2805_v55 = vld [vmem:[%s5195_s17 + $0x8] sm:$0xff] }
0x109a   :  { %v2250_v49 = vmul.f32 1.442695, %v2248_v46  ;;  %v2252_v50 = vmul.f32 1.442695, %v2249_v48  ;;  %v2823_v46 = vld [vmem:[%s5195_s17 + $0x98] sm:$0xff]  ;;  %v4866_v48 = vpack.c.bf16 %v2805_v55, %v2804_v45  ;;  %v2922_v55 = vld [vmem:[%s5197_s18 + $0x8] sm:$0xff] }
0x109c   :  { %4238 = vpow2.f32 %v2250_v49  ;;  %4048 = vmatpush3.bf16.msra.mxu0 %v4866_v48 }
0x109d   :  { %4240 = vpow2.f32 %v2252_v50  ;;  %v2806_v50 = vld [vmem:[%s5195_s17 + $0x10] sm:$0xff] }
0x10a6   :  { %v4239_v51 = vpop.eup %4238 }
0x10a7   :  { %v4241_v62 = vpop.eup %4240  ;;  %v2254_v7 = vsel %vm97_vm2, %v4239_v51, 0.0 }
0x10a8   :  { %v2255_v9 = vsel %vm97_vm2, %v4241_v62, 0.0 }
0x10a9   :  { %v2256_v52 = vadd.f32 %v2255_v9, %v2254_v7  ;;  %v2825_v7 = vld [vmem:[%s5195_s17 + $0xa8] sm:$0xff] }
0x10ab   :  { %v2257_v53 = vrot.slane %v2256_v52, 4 }
0x10ad   :  { %v2258_v14 = vadd.f32 %v2257_v53, %v2256_v52  ;;  %v2808_v53 = vld [vmem:[%s5195_s17 + $0x20] sm:$0xff] }
0x10af   :  { %v2259_v54 = vrot.slane %v2258_v14, 2 }
0x10b1   :  { %v2260_v17 = vadd.f32 %v2259_v54, %v2258_v14  ;;  %v2809_v14 = vld [vmem:[%s5195_s17 + $0x28] sm:$0xff]  ;;  %v2826_v54 = vld [vmem:[%s5195_s17 + $0xb0] sm:$0xff] }
0x10b3   :  { %v2261_v57 = vrot.slane %v2260_v17, 1 }
0x10b5   :  { %v2262_v38 = vadd.f32 %v2261_v57, %v2260_v17  ;;  %v2827_v17 = vld [vmem:[%s5195_s17 + $0xb8] sm:$0xff]  ;;  %v4901_v57 = vpack.c.bf16 %v2809_v14, %v2808_v53 }
0x10b7   :  { %4242 = vrcp.f32 %v2262_v38  ;;  %v4904_v38 = vpack.c.bf16 %v2827_v17, %v2826_v54 }
0x10c1   :  { %v4243_v40 = vpop.eup %4242 }
0x10c2   :  { %v2264_v58 = vmul.f32 %v4243_v40, %v4239_v51  ;;  %v2265_v59 = vmul.f32 %v4243_v40, %v4241_v62  ;;  %v2807_v51 = vld [vmem:[%s5195_s17 + $0x18] sm:$0xff]  ;;  %v2824_v62 = vld [vmem:[%s5195_s17 + $0xa0] sm:$0xff]  ;;  %v2810_v40 = vld [vmem:[%s5195_s17 + $0x30] sm:$0xff] }
0x10c3   :  { %v4883_v9 = vpack.c.bf16 %v2807_v51, %v2806_v50  ;;  %v4886_v52 = vpack.c.bf16 %v2825_v7, %v2824_v62 }
0x10c4   :  { %v2266_v36 = vmul.f32 %v2264_v58, %v4616_v10  ;;  %v2267_v61 = vmul.f32 %v2265_v59, %v4621_v47  ;;  %v4138_v10 = vld [vmem:[%s5194_s14 + $0x4] ss:$8 sps:$4 sm:$0xff]   ;;  %v4136_v47 = vld [vmem:[%s5194_s14] ss:$8 sps:$4 sm:$0xff]   ;;  %v2811_v58 = vld [vmem:[%s5195_s17 + $0x38] sm:$0xff] }
0x10c5   :  { %v2828_v59 = vld [vmem:[%s5195_s17 + $0xc0] sm:$0xff] }
0x10c6   :  { %3954 = vmatprep.mubr.msk.f32.mxu1 %vm97_vm2, %v2266_v36  ;;  %v2829_v36 = vld [vmem:[%s5195_s17 + $0xc8] sm:$0xff] }
0x10c7   :  { %3955 = vmatmul.mubr.msk.f32.vlgmr.msra.gmra.mrb[24].mxu1 %vm97_vm2, %v2267_v61  ;;  %v4922_v61 = vpack.c.bf16 %v2829_v36, %v2828_v59 }
0x10c8   :  { %2511 = vmatpush1.bf16.msra.mxu1 %v4130_v11  ;;  %2542 = vmatprep.mubr.bf16.mxu1 %v4266_v63  ;;  %v4919_v11 = vpack.c.bf16 %v2811_v58, %v2810_v40 }
0x10c9   :  { %2512 = vmatprep.subr.bf16.mxu1 %v4135_v1  ;;  %v2812_v1 = vld [vmem:[%s5195_s17 + $0x40] sm:$0xff] }
0x10cc   :  { %2513 = vmatpush1.bf16.msra.mxu1 %v4133_v5  ;;  %v2813_v5 = vld [vmem:[%s5195_s17 + $0x48] sm:$0xff] }
0x10cd   :  { %2723 = vmatprep.subr.bf16.mxu1 %v4138_v10  ;;  %v2830_v10 = vld [vmem:[%s5195_s17 + $0xd0] sm:$0xff] }
0x10cf   :  { %3502 = vmatmul.mubr.msk.bf16.vlgmr.msra.gmra.mrb[28].mxu1 %vm190_vm1, %v4392_v4  ;;  %v4147_v4 = vld [vmem:[%s5194_s14 + $0x34] ss:$8 sps:$4 sm:$0xff]  }
0x10d0   :  { %2724 = vmatpush1.bf16.msra.mxu1 %v4136_v47  ;;  %2552 = vmatprep.mubr.bf16.mxu1 %v4266_v63  ;;  %v4145_v63 = vld [vmem:[%s5194_s14 + $0x30] ss:$8 sps:$4 sm:$0xff]  }
0x10d1   :  { %2725 = vmatprep.subr.bf16.mxu1 %v4141_v6  ;;  %v2831_v47 = vld [vmem:[%s5195_s17 + $0xd8] sm:$0xff]  ;;  %v4063_v6 = vpack.c.bf16 %v2813_v5, %v2812_v1 }
0x10d4   :  { %2726 = vmatpush1.bf16.msra.mxu1 %v4139_v12  ;;  %v4065_v12 = vpack.c.bf16 %v2831_v47, %v2830_v10 }
0x10d5   :  { %2727 = vmatprep.subr.bf16.mxu1 %v4144_v13  ;;  %v2814_v13 = vld [vmem:[%s5195_s17 + $0x50] sm:$0xff] }
0x10d7   :  { %3503 = vmatmul.mubr.msk.bf16.gmra.mrb[32].mxu1 %vm190_vm1, %v4576_v41  ;;  %v4153_v41 = vld [vmem:[%s5194_s14 + $0x54] ss:$8 sps:$4 sm:$0xff]  }
0x10d8   :  { %2728 = vmatpush1.bf16.msra.mxu1 %v4142_v15  ;;  %2755 = vmatprep.mubr.bf16.mxu1 %v4718_v24  ;;  %v4160_v24 = vld [vmem:[%s5194_s14 + $0x80] ss:$8 sps:$4 sm:$0xff]   ;;  %v2815_v15 = vld [vmem:[%s5195_s17 + $0x58] sm:$0xff] }
0x10d9   :  { %2729 = vmatprep.subr.bf16.mxu1 %v4147_v4  ;;  %v2832_v4 = vld [vmem:[%s5195_s17 + $0xe0] sm:$0xff] }
0x10dc   :  { %2730 = vmatpush1.bf16.msra.mxu1 %v4145_v63  ;;  %v2833_v63 = vld [vmem:[%s5195_s17 + $0xe8] sm:$0xff] }
0x10dd   :  { %2731 = vmatprep.subr.bf16.mxu1 %v4150_v16  ;;  %v4067_v16 = vpack.c.bf16 %v2815_v15, %v2814_v13 }
0x10e0   :  { %2732 = vmatpush1.bf16.msra.mxu1 %v4148_v20  ;;  %v4069_v20 = vpack.c.bf16 %v2833_v63, %v2832_v4 }
0x10e1   :  { %2733 = vmatprep.subr.bf16.mxu1 %v4153_v41  ;;  %v2816_v41 = vld [vmem:[%s5195_s17 + $0x60] sm:$0xff] }
0x10e4   :  { %2734 = vmatpush1.bf16.msra.mxu1 %v4151_v18  ;;  %v2817_v18 = vld [vmem:[%s5195_s17 + $0x68] sm:$0xff] }
0x10e5   :  { %2735 = vmatprep.subr.bf16.mxu1 %v4156_v19  ;;  %v4071_v19 = vpack.c.bf16 %v2817_v18, %v2816_v41 }
0x10e8   :  { %2736 = vmatpush1.bf16.msra.mxu1 %v4154_v21  ;;  %v2834_v21 = vld [vmem:[%s5195_s17 + $0xf0] sm:$0xff] }
0x10e9   :  { %2737 = vmatprep.subr.bf16.mxu1 %v4159_v8  ;;  %v2835_v8 = vld [vmem:[%s5195_s17 + $0xf8] sm:$0xff] }
0x10ec   :  { %2738 = vmatpush1.bf16.msra.mxu1 %v4157_v56  ;;  %v4073_v56 = vpack.c.bf16 %v2835_v8, %v2834_v21 }
0x10ed   :  { %2739 = vmatprep.subr.bf16.mxu1 %v4162_v60  ;;  %v2818_v60 = vld [vmem:[%s5195_s17 + $0x70] sm:$0xff] }
0x10f0   :  { %2740 = vmatpush1.bf16.msra.mxu1 %v4160_v24  ;;  %v2819_v24 = vld [vmem:[%s5195_s17 + $0x78] sm:$0xff] }
0x10f1   :  { %2741 = vmatprep.subr.bf16.mxu1 %v4165_v42  ;;  %v4075_v42 = vpack.c.bf16 %v2819_v24, %v2818_v60 }
0x10f4   :  { %2742 = vmatpush1.bf16.msra.mxu1 %v4163_v25 }
0x10f5   :  { %2743 = vmatprep.subr.bf16.mxu1 %v4168_v26 }
0x10f8   :  { %2744 = vmatpush1.bf16.msra.mxu1 %v4166_v43 }
0x10f9   :  { %2745 = vmatprep.subr.bf16.mxu1 %v4171_v27  ;;  %v2784_v27 = vsub.s32 1, %v4530_v22 }
0x10fc   :  { %2746 = vmatpush1.bf16.msra.mxu1 %v4169_v28  ;;  %v2776_v28 = vld [vmem:[%s5196_s16] sm:$0x3] }
0x10fd   :  { %2747 = vmatprep.subr.bf16.mxu1 %v4174_v29  ;;  %v4974_v29 = vrot.slane %v2776_v28, %v4533_v23 }
0x1100   :  { %2748 = vmatpush1.bf16.msra.mxu1 %v4172_v31  ;;  %v4976_v31 = vrot.slane %v2776_v28, %v2784_v27 }
0x1101   :  { %2749 = vmatprep.subr.bf16.mxu1 %v4177_v32 }
0x1104   :  { %2750 = vmatpush1.bf16.msra.mxu1 %v4175_v37 }
0x1105   :  { %2751 = vmatprep.subr.bf16.mxu1 %v4180_v33 }
0x1108   :  { %2752 = vmatpush1.bf16.msra.mxu1 %v4178_v34 }
0x1109   :  { %2753 = vmatprep.subr.bf16.mxu1 %v4183_v39 }
0x110c   :  { %2754 = vmatpush1.bf16.msra.mxu1 %v4181_v35 }
0x110d   :  { %2935 = vmatprep.subr.mxu1 %v2922_v55 }
0x110f   :  { %2756 = vmatmul.mubr.bf16.vlgmr.msra.gmra.mrb[28].mxu1 %v4716_v30  ;;  %v2822_v30 = vld [vmem:[%s5195_s17 + $0x90] sm:$0xff] }
0x1110   :  { %v4868_v49 = vpack.c.bf16 %v2823_v46, %v2822_v30  ;;  %v2921_v30 = vld [vmem:[%s5197_s18] sm:$0xff] }
0x1111   :  { %2936 = vmatpush1.msra.mxu1 %v2921_v30 }
0x1112   :  { %4050 = vmatprep.subr.bf16.mxu0 %v4868_v49  ;;  %3137 = vmatprep.subr.mxu1 %v2922_v55  ;;  %v4193_v55 = vld [vmem:[%s5198_s19 + $0x20] sm:$0xff]  }
0x1113   :  { %4052 = vmatpush3.bf16.msra.mxu0 %v4883_v9 }
0x1114   :  { %4054 = vmatprep.subr.bf16.mxu0 %v4886_v52 }
0x1117   :  { %4056 = vmatpush3.bf16.msra.mxu0 %v4901_v57 }
0x1118   :  { %4058 = vmatprep.subr.bf16.mxu0 %v4904_v38 }
0x111b   :  { %4060 = vmatpush3.bf16.msra.mxu0 %v4919_v11 }
0x111c   :  { %4062 = vmatprep.subr.bf16.mxu0 %v4922_v61 }
0x111f   :  { %4064 = vmatpush3.bf16.msra.mxu0 %v4063_v6 }
0x1120   :  { %4066 = vmatprep.subr.bf16.mxu0 %v4065_v12 }
0x1123   :  { %4068 = vmatpush3.bf16.msra.mxu0 %v4067_v16 }
0x1124   :  { %4070 = vmatprep.subr.bf16.mxu0 %v4069_v20 }
0x1127   :  { %4072 = vmatpush3.bf16.msra.mxu0 %v4071_v19 }
0x1128   :  { %4074 = vmatprep.subr.bf16.mxu0 %v4073_v56 }
0x112b   :  { %4076 = vmatpush3.bf16.msra.mxu0 %v4075_v42 }
0x112c   :  { %4078 = vmatprep.subr.bf16.mxu0 %v4045_v0 }
0x119a   :  { %v3956_v25 = vpop.f32.mrb[24].mxu1 }
0x119b   :  { %v2340_v26 = vpop.f32.mrb[25].mxu1 }
0x119c   :  { %v2350_v43 = vpack.c.bf16 %v3956_v25, %v2340_v26 }
0x119e   :  { %3497 = vmatmul.mubr.msk.bf16.gmra.mrb[32].mxu0 %vm190_vm1, %v2350_v43 }
0x11e2   :  { %v2757_v32 = vpop.f32.mrb[28].mxu1 }
0x11e3   :  { %v4979_v37 = vadd.f32 %v4974_v29, %v2757_v32  ;;  %v2759_v33 = vpop.f32.mrb[29].mxu1 }
0x11e4   :  { %v4982_v34 = vadd.f32 %v4976_v31, %v2759_v33  ;;  %v2761_v39 = vpop.f32.mrb[30].mxu1 }
0x11e5   :  { %v2763_v35 = vpop.f32.mrb[31].mxu1  ;;  %v2796_v23 = vmax.f32 %v4979_v37, 0.0  ;;  %v4990_v44 = vadd.f32 %v4974_v29, %v2761_v39  ;;  %v4185_v39 = vld [vmem:[%s5198_s19] sm:$0xff]  }
0x11e6   :  { %v2797_v22 = vmax.f32 %v4982_v34, 0.0  ;;  %v4986_v2 = vadd.f32 %v4976_v31, %v2763_v35  ;;  %v4184_v34 = vld [vmem:[%s5198_s19 + $0x40] sm:$0xff]   ;;  %v4186_v35 = vld [vmem:[%s5198_s19 + $0x48] sm:$0xff]  }
0x11e7   :  { %v2798_v0 = vmax.f32 %v4990_v44, 0.0  ;;  %v4190_v44 = vld [vmem:[%s5198_s19 + $0x58] sm:$0xff]  }
0x11e8   :  { %v2799_v45 = vmax.f32 %v4986_v2, 0.0  ;;  %2900 = vmatprep.mubr.f32.mxu0 %v2797_v22  ;;  %v4188_v2 = vld [vmem:[%s5198_s19 + $0x50] sm:$0xff]  }
0x11e9   :  { %2901 = vmatmul.mubr.f32.vlgmr.msra.gmra.mrb[26].mxu0 %v2796_v23 }
0x11ea   :  { %2905 = vmatprep.mubr.f32.mxu0 %v2799_v45  ;;  %4080 = vmatpush3.bf16.msra.mxu0 %v4866_v48 }
0x11eb   :  { %4082 = vmatprep.subr.bf16.mxu0 %v4868_v49 }
0x11ed   :  { %2906 = vmatmul.mubr.f32.gmra.mrb[36].mxu0 %v2798_v0 }
0x11ee   :  { %4084 = vmatpush3.bf16.msra.mxu0 %v4883_v9 }
0x11ef   :  { %4086 = vmatprep.subr.bf16.mxu0 %v4886_v52 }
0x11f2   :  { %4088 = vmatpush3.bf16.msra.mxu0 %v4901_v57 }
0x11f3   :  { %4090 = vmatprep.subr.bf16.mxu0 %v4904_v38 }
0x11f6   :  { %4092 = vmatpush3.bf16.msra.mxu0 %v4919_v11 }
0x11f7   :  { %4094 = vmatprep.subr.bf16.mxu0 %v4922_v61 }
0x11fa   :  { %4096 = vmatpush3.bf16.msra.mxu0 %v4063_v6 }
0x11fb   :  { %4098 = vmatprep.subr.bf16.mxu0 %v4065_v12 }
0x11fe   :  { %4100 = vmatpush3.bf16.msra.mxu0 %v4067_v16 }
0x11ff   :  { %4102 = vmatprep.subr.bf16.mxu0 %v4069_v20 }
0x1202   :  { %4104 = vmatpush3.bf16.msra.mxu0 %v4071_v19 }
0x1203   :  { %4106 = vmatprep.subr.bf16.mxu0 %v4073_v56 }
0x1206   :  { %4108 = vmatpush3.bf16.msra.mxu0 %v4075_v42 }
0x1207   :  { %3743 = vmatprep.subr.bf16.mxu0 %v4184_v34 }
0x1271   :  { %v2425_v46 = vpop.f32.mrb[32].mxu0 }
0x1272   :  { %v2427_v48 = vpop.f32.mrb[33].mxu0  ;;  %v2438_v50 = vmax.f32 %v2425_v46, 0.0  ;;  %v4195_v46 = vld [vmem:[%s5198_s19 + $0x28] sm:$0xff]  }
0x1273   :  { %v2429_v49 = vpop.f32.mrb[34].mxu0  ;;  %v2439_v7 = vmax.f32 %v2427_v48, 0.0  ;;  %v4196_v48 = vld [vmem:[%s5198_s19 + $0x70] sm:$0xff]  }
0x1274   :  { %v2440_v51 = vmax.f32 %v2429_v49, 0.0  ;;  %v2431_v62 = vpop.f32.mrb[35].mxu0  ;;  %v4197_v49 = vld [vmem:[%s5198_s19 + $0x30] sm:$0xff]  }
0x1275   :  { %v2441_v9 = vmax.f32 %v2431_v62, 0.0 }
0x1276   :  { %v2444_v52 = vpack.c.bf16 %v2440_v51, %v2438_v50  ;;  %v4198_v50 = vld [vmem:[%s5198_s19 + $0x78] sm:$0xff]  }
0x1277   :  { %v2445_v53 = vpack.c.bf16 %v2441_v9, %v2439_v7  ;;  %v4199_v51 = vld [vmem:[%s5198_s19 + $0x38] sm:$0xff]  }
0x1279   :  { %2765 = vmatprep.mubr.bf16.mxu1 %v2445_v53 }
0x127a   :  { %2766 = vmatmul.mubr.bf16.gmra.mrb[32].mxu1 %v2444_v52 }
0x127b   :  { %2999 = vmatprep.mubr.f32.mxu1 %v4262_v3 }
0x12bc   :  { %v3687_v14 = vpop.f32.mrb[26].mxu0 }
0x12bd   :  { %v3688_v54 = vpop.f32.mrb[27].mxu0 }
0x12be   :  { %v3689_v17 = vadd.f32 %v3688_v54, %v3687_v14 }
0x12c0   :  { %v3690_v57 = vpop.f32.mrb[36].mxu0  ;;  %3536 = vmatmul.mubr.msk.f32.vlgmr.msra.gmra.mrb[26].mxu1 %vm461_vm8, %v3689_v17 }
0x12c1   :  { %v3691_v38 = vpop.f32.mrb[37].mxu0  ;;  %3005 = vmatprep.mubr.f32.mxu1 %v4262_v3  ;;  %3138 = vmatpush1.msra.mxu1 %v2921_v30  ;;  %v4194_v30 = vld [vmem:[%s5198_s19 + $0x68] sm:$0xff]  }
0x12c2   :  { %v3692_v40 = vadd.f32 %v3691_v38, %v3690_v57 }
0x12c4   :  { %3537 = vmatmul.mubr.msk.f32.gmra.mrb[36].mxu1 %vm461_vm8, %v3692_v40 }
0x12c5   :  { %3011 = vmatprep.mubr.f32.mxu1 %v4262_v3 }
0x134d   :  { %v2767_v58 = vpop.f32.mrb[32].mxu1 }
0x134e   :  { %v5022_v59 = vadd.f32 %v4974_v29, %v2767_v58  ;;  %v2769_v36 = vpop.f32.mrb[33].mxu1 }
0x134f   :  { %v5025_v11 = vadd.f32 %v4976_v31, %v2769_v36  ;;  %v2771_v61 = vpop.f32.mrb[34].mxu1 }
0x1350   :  { %v2773_v1 = vpop.f32.mrb[35].mxu1  ;;  %v2800_v47 = vmax.f32 %v5022_v59, 0.0  ;;  %v5033_v6 = vadd.f32 %v4974_v29, %v2771_v61 }
0x1351   :  { %v2801_v5 = vmax.f32 %v5025_v11, 0.0  ;;  %v5029_v10 = vadd.f32 %v4976_v31, %v2773_v1 }
0x1352   :  { %v2802_v13 = vmax.f32 %v5033_v6, 0.0 }
0x1353   :  { %v2803_v12 = vmax.f32 %v5029_v10, 0.0  ;;  %2910 = vmatprep.mubr.f32.mxu0 %v2801_v5 }
0x1354   :  { %2911 = vmatmul.mubr.f32.gmra.mrb[38].mxu0 %v2800_v47 }
0x1355   :  { %2915 = vmatprep.mubr.f32.mxu0 %v2803_v12 }
0x1358   :  { %2916 = vmatmul.mubr.f32.gmra.mrb[40].mxu0 %v2802_v13 }
0x1393   :  { %v3001_v15 = vpop.f32.mrb[26].mxu1 }
0x1394   :  { %v5047_v4 = vsub.f32 %v2796_v23, %v3001_v15  ;;  %v3003_v63 = vpop.f32.mrb[27].mxu1  ;;  %v4189_v23 = vld [vmem:[%s5198_s19 + $0x10] sm:$0xff]  }
0x1395   :  { %v5051_v16 = vsub.f32 %v2797_v22, %v3003_v63  ;;  %v4187_v22 = vld [vmem:[%s5198_s19 + $0x8] sm:$0xff]  }
0x1396   :  { %v3032_v18 = vmul.f32 %v5047_v4, %v5047_v4 }
0x1397   :  { %v3033_v20 = vmul.f32 %v5051_v16, %v5051_v16  ;;  %v3007_v41 = vpop.f32.mrb[36].mxu1 }
0x1398   :  { %v5059_v19 = vsub.f32 %v2798_v0, %v3007_v41  ;;  %v3009_v21 = vpop.f32.mrb[37].mxu1  ;;  %v4192_v0 = vld [vmem:[%s5198_s19 + $0x60] sm:$0xff]  }
0x1399   :  { %v5063_v8 = vsub.f32 %v2799_v45, %v3009_v21  ;;  %3104 = vmatprep.mubr.f32.mxu0 %v3033_v20  ;;  %v4191_v45 = vld [vmem:[%s5198_s19 + $0x18] sm:$0xff]  }
0x139a   :  { %3105 = vmatmul.mubr.f32.vlgmr.msra.gmra.mrb[42].mxu0 %v3032_v18  ;;  %v3034_v60 = vmul.f32 %v5059_v19, %v5059_v19 }
0x139b   :  { %v3035_v56 = vmul.f32 %v5063_v8, %v5063_v8  ;;  %3744 = vmatpush3.bf16.msra.mxu0 %v4185_v39 }
0x139c   :  { %3745 = vmatprep.subr.bf16.mxu0 %v4186_v35 }
0x139d   :  { %3109 = vmatprep.mubr.f32.mxu0 %v3035_v56 }
0x139e   :  { %3110 = vmatmul.mubr.f32.gmra.mrb[44].mxu0 %v3034_v60 }
0x139f   :  { %3746 = vmatpush3.bf16.msra.mxu0 %v4187_v22 }
0x13a0   :  { %3747 = vmatprep.subr.bf16.mxu0 %v4188_v2 }
0x13a3   :  { %3748 = vmatpush3.bf16.msra.mxu0 %v4189_v23 }
0x13a4   :  { %3749 = vmatprep.subr.bf16.mxu0 %v4190_v44 }
0x13a7   :  { %3750 = vmatpush3.bf16.msra.mxu0 %v4191_v45 }
0x13a8   :  { %3751 = vmatprep.subr.bf16.mxu0 %v4192_v0 }
0x13ab   :  { %3752 = vmatpush3.bf16.msra.mxu0 %v4193_v55 }
0x13ac   :  { %3753 = vmatprep.subr.bf16.mxu0 %v4194_v30 }
0x13af   :  { %3754 = vmatpush3.bf16.msra.mxu0 %v4195_v46 }
0x13b0   :  { %3755 = vmatprep.subr.bf16.mxu0 %v4196_v48 }
0x13b3   :  { %3756 = vmatpush3.bf16.msra.mxu0 %v4197_v49 }
0x13b4   :  { %3757 = vmatprep.subr.bf16.mxu0 %v4198_v50 }
0x13b7   :  { %3758 = vmatpush3.bf16.msra.mxu0 %v4199_v51 }
0x1427   :  { %v3693_v24 = vpop.f32.mrb[38].mxu0 }
0x1428   :  { %v3694_v42 = vpop.f32.mrb[39].mxu0 }
0x1429   :  { %v3695_v25 = vadd.f32 %v3694_v42, %v3693_v24 }
0x142b   :  { %v3696_v26 = vpop.f32.mrb[40].mxu0  ;;  %3538 = vmatmul.mubr.msk.f32.gmra.mrb[38].mxu1 %vm461_vm8, %v3695_v25 }
0x142c   :  { %v3697_v43 = vpop.f32.mrb[41].mxu0  ;;  %3017 = vmatprep.mubr.f32.mxu1 %v4262_v3 }
0x142d   :  { %v3698_v27 = vadd.f32 %v3697_v43, %v3696_v26 }
0x142f   :  { %3539 = vmatmul.mubr.msk.f32.gmra.mrb[40].mxu1 %vm461_vm8, %v3698_v27 }
0x1430   :  { %3201 = vmatprep.mubr.f32.mxu1 %v4262_v3 }
0x146d   :  { %v3731_v28 = vpop.f32.mrb[42].mxu0 }
0x146e   :  { %v3732_v29 = vpop.f32.mrb[43].mxu0 }
0x146f   :  { %v3733_v31 = vadd.f32 %v3732_v29, %v3731_v28 }
0x1471   :  { %v3734_v32 = vpop.f32.mrb[44].mxu0  ;;  %3540 = vmatmul.mubr.msk.f32.vlgmr.msra.gmra.mrb[42].mxu1 %vm461_vm8, %v3733_v31 }
0x1472   :  { %v3735_v37 = vpop.f32.mrb[45].mxu0  ;;  %3207 = vmatprep.mubr.f32.mxu1 %v4262_v3 }
0x1473   :  { %v3736_v33 = vadd.f32 %v3735_v37, %v3734_v32 }
0x1475   :  { %3541 = vmatmul.mubr.msk.f32.gmra.mrb[44].mxu1 %vm461_vm8, %v3736_v33 }
0x1476   :  { %3213 = vmatprep.mubr.f32.mxu1 %v4262_v3 }
0x14fe   :  { %v3013_v62 = vpop.f32.mrb[38].mxu1 }
0x14ff   :  { %v5127_v7 = vsub.f32 %v2800_v47, %v3013_v62  ;;  %v3015_v9 = vpop.f32.mrb[39].mxu1 }
0x1500   :  { %v5131_v52 = vsub.f32 %v2801_v5, %v3015_v9 }
0x1501   :  { %v3036_v54 = vmul.f32 %v5127_v7, %v5127_v7 }
0x1502   :  { %v3037_v53 = vmul.f32 %v5131_v52, %v5131_v52  ;;  %v3019_v14 = vpop.f32.mrb[40].mxu1 }
0x1503   :  { %v5139_v17 = vsub.f32 %v2802_v13, %v3019_v14  ;;  %v3021_v57 = vpop.f32.mrb[41].mxu1 }
0x1504   :  { %v5143_v38 = vsub.f32 %v2803_v12, %v3021_v57  ;;  %3114 = vmatprep.mubr.f32.mxu0 %v3037_v53 }
0x1505   :  { %3115 = vmatmul.mubr.f32.gmra.mrb[46].mxu0 %v3036_v54  ;;  %v3038_v58 = vmul.f32 %v5139_v17, %v5139_v17 }
0x1506   :  { %v3039_v40 = vmul.f32 %v5143_v38, %v5143_v38 }
0x1508   :  { %3119 = vmatprep.mubr.f32.mxu0 %v3039_v40 }
0x1509   :  { %3120 = vmatmul.mubr.f32.gmra.mrb[48].mxu0 %v3038_v58 }
0x1544   :  { %v3203_v59 = vpop.f32.mrb[42].mxu1 }
0x1545   :  { %v3204_v36 = vadd.f32 1e-05, %v3203_v59  ;;  %v3205_v11 = vpop.f32.mrb[43].mxu1 }
0x1546   :  { %v3206_v61 = vadd.f32 1e-05, %v3205_v11 }
0x1547   :  { %4244 = vrsqrt.f32 %v3204_v36 }
0x1548   :  { %v3209_v1 = vpop.f32.mrb[44].mxu1  ;;  %4246 = vrsqrt.f32 %v3206_v61 }
0x1549   :  { %v3210_v5 = vadd.f32 1e-05, %v3209_v1  ;;  %v3211_v10 = vpop.f32.mrb[45].mxu1 }
0x154a   :  { %v3212_v47 = vadd.f32 1e-05, %v3211_v10 }
0x154b   :  { %4248 = vrsqrt.f32 %v3210_v5 }
0x154c   :  { %4250 = vrsqrt.f32 %v3212_v47 }
0x1551   :  { %v4245_v6 = vpop.eup %4244 }
0x1552   :  { %v4247_v12 = vpop.eup %4246  ;;  %v3234_v63 = vmul.f32 %v4245_v6, %v5047_v4 }
0x1553   :  { %v3235_v41 = vmul.f32 %v4247_v12, %v5051_v16  ;;  %v3544_v16 = vld [vmem:[%s5199_s20] ss:$0 sm:$0xff] }
0x1555   :  { %v4249_v13 = vpop.eup %4248 }
0x1556   :  { %v4251_v15 = vpop.eup %4250  ;;  %v3236_v20 = vmul.f32 %v4249_v13, %v5059_v19 }
0x1557   :  { %v3237_v18 = vmul.f32 %v4251_v15, %v5063_v8 }
0x1558   :  { %v3242_v21 = vpack.c.bf16 %v3236_v20, %v3234_v63 }
0x1559   :  { %v3243_v56 = vpack.c.bf16 %v3237_v18, %v3235_v41 }
0x155b   :  { %3413 = vmatprep.mubr.bf16.mxu0 %v3243_v56 }
0x155c   :  { %3414 = vmatmul.mubr.bf16.vlgmr.msra.gmra.mrb[52].mxu0 %v3242_v21 }
0x15d8   :  { %v3737_v60 = vpop.f32.mrb[46].mxu0 }
0x15d9   :  { %v3738_v24 = vpop.f32.mrb[47].mxu0 }
0x15da   :  { %v3739_v42 = vadd.f32 %v3738_v24, %v3737_v60 }
0x15dc   :  { %v3740_v25 = vpop.f32.mrb[48].mxu0  ;;  %3542 = vmatmul.mubr.msk.f32.gmra.mrb[46].mxu1 %vm461_vm8, %v3739_v42 }
0x15dd   :  { %v3741_v26 = vpop.f32.mrb[49].mxu0  ;;  %3219 = vmatprep.mubr.f32.mxu1 %v4262_v3 }
0x15de   :  { %v3742_v4 = vadd.f32 %v3741_v26, %v3740_v25 }
0x15e0   :  { %3543 = vmatmul.mubr.msk.f32.gmra.mrb[48].mxu1 %vm461_vm8, %v3742_v4 }
0x162f   :  { %v3759_v19 = vpop.f32.mrb[52].mxu0 }
0x1630   :  { %v3760_v8 = vpop.f32.mrb[53].mxu0 }
0x1631   :  { %v3761_v43 = vadd.f32 %v3760_v8, %v3759_v19  ;;  %v3762_v27 = vpop.f32.mrb[54].mxu0 }
0x1632   :  { %v3763_v28 = vpop.f32.mrb[55].mxu0 }
0x1633   :  { %v3416_v29 = vadd.f32 %v3761_v43, %v3544_v16  ;;  %v3764_v31 = vadd.f32 %v3763_v28, %v3762_v27 }
0x1635   :  { %3430 = vst.msk [vmem:[%s5200_s21] sm:$0xff] %vm377_vm7, %v3416_v29  ;;  %v3419_v3 = vadd.f32 %v3764_v31, %v3544_v16 }
0x1637   :  { %3431 = vst.msk [vmem:[%s5200_s21 + $0x8] sm:$0xff] %vm377_vm7, %v3419_v3 }
0x16af   :  { %v3215_v32 = vpop.f32.mrb[46].mxu1 }
0x16b0   :  { %v3216_v37 = vadd.f32 1e-05, %v3215_v32  ;;  %v3217_v33 = vpop.f32.mrb[47].mxu1 }
0x16b1   :  { %v3218_v34 = vadd.f32 1e-05, %v3217_v33 }
0x16b2   :  { %4252 = vrsqrt.f32 %v3216_v37 }
0x16b3   :  { %v3221_v39 = vpop.f32.mrb[48].mxu1  ;;  %4254 = vrsqrt.f32 %v3218_v34 }
0x16b4   :  { %v3222_v35 = vadd.f32 1e-05, %v3221_v39  ;;  %v3223_v22 = vpop.f32.mrb[49].mxu1 }
0x16b5   :  { %v3224_v2 = vadd.f32 1e-05, %v3223_v22 }
0x16b6   :  { %4256 = vrsqrt.f32 %v3222_v35 }
0x16b7   :  { %4258 = vrsqrt.f32 %v3224_v2 }
0x16bc   :  { %v4253_v23 = vpop.eup %4252 }
0x16bd   :  { %v4255_v44 = vpop.eup %4254  ;;  %v3238_v55 = vmul.f32 %v4253_v23, %v5127_v7 }
0x16be   :  { %v3239_v46 = vmul.f32 %v4255_v44, %v5131_v52 }
0x16c0   :  { %v4257_v45 = vpop.eup %4256 }
0x16c1   :  { %v4259_v0 = vpop.eup %4258  ;;  %v3240_v30 = vmul.f32 %v4257_v45, %v5139_v17 }
0x16c2   :  { %v3241_v48 = vmul.f32 %v4259_v0, %v5143_v38 }
0x16c3   :  { %v3244_v49 = vpack.c.bf16 %v3240_v30, %v3238_v55 }
0x16c4   :  { %v3245_v50 = vpack.c.bf16 %v3241_v48, %v3239_v46 }
0x16c6   :  { %3421 = vmatprep.mubr.bf16.mxu0 %v3245_v50 }
0x16c7   :  { %3422 = vmatmul.mubr.bf16.gmra.mrb[56].mxu0 %v3244_v49 }
0x179a   :  { %v3765_v51 = vpop.f32.mrb[56].mxu0 }
0x179b   :  { %v3766_v62 = vpop.f32.mrb[57].mxu0 }
0x179c   :  { %v3767_v9 = vadd.f32 %v3766_v62, %v3765_v51  ;;  %v3768_v53 = vpop.f32.mrb[58].mxu0 }
0x179d   :  { %v3769_v14 = vpop.f32.mrb[59].mxu0 }
0x179e   :  { %v3424_v54 = vadd.f32 %v3767_v9, %v3544_v16  ;;  %v3770_v57 = vadd.f32 %v3769_v14, %v3768_v53 }
0x17a0   :  { %3432 = vst.msk [vmem:[%s5200_s21 + $0x10] sm:$0xff] %vm377_vm7, %v3424_v54  ;;  %v3427_v7 = vadd.f32 %v3770_v57, %v3544_v16 }
0x17a2   :  { %3433 = vst.msk [vmem:[%s5200_s21 + $0x18] sm:$0xff] %vm377_vm7, %v3427_v7 }

</bundles_post_ra>
